<compile_context>
chip_gen: v7x
topology: tpu7x:2x2x1
jax: 0.10.0
libtpu: 0.0.40
codegen_flags: <defaults>
</compile_context>

<pallas_src>
import functools

import numpy as np
import jax
import jax.numpy as jnp
from jax.experimental import pallas as pl
from jax.experimental.pallas import tpu as pltpu


_INV_SQRT2 = 0.7071067811865476


def _round_up(x, m):
    return (x + m - 1) // m * m


def _pick_tile(m, row_tile):
    """Row tile (MXU M dim / DMA tile height). Default >=256; split small M into >=2 steps."""
    row_tile = max(16, _round_up(row_tile, 16))
    if m >= 2 * row_tile:
        return row_tile
    # Small token counts: aim for (at least) two grid steps so both TensorCores on
    # multi-core chips (v7x) get work; keep the tile a multiple of 16 (bf16 sublane packing).
    half = _round_up(max((m + 1) // 2, 1), 16)
    return min(row_tile, half)


def _erf_poly(x):
    # Abramowitz & Stegun 7.1.26 (|abs err| < 1.5e-7): exact-GELU semantics using only
    # exp + an EUP reciprocal (no erf primitive lowering needed, no VALU divide).
    z = jnp.abs(x)
    t = pl.reciprocal(1.0 + 0.3275911 * z, approx=True)
    poly = t * (0.254829592 + t * (-0.284496736 + t * (1.421413741
               + t * (-1.453152027 + t * 1.061405429))))
    y = 1.0 - poly * jnp.exp(-z * z)
    return jnp.where(x >= 0.0, y, -y)


def _gelu_exact(x):
    # torch.nn.GELU() default: 0.5 * x * (1 + erf(x / sqrt(2)))
    return 0.5 * x * (1.0 + _erf_poly(x * _INV_SQRT2))


# ------------------------------------------------------------------
# Fused adapter kernels.
# ------------------------------------------------------------------
def _adapter_merge_kernel(starts_ref, x_hbm, wm_ref, win_ref, wout_ref, o_ref,
                          gbuf, sem, *, k, d, tm, eps):
    """RMSNorm + merging_layer + w_in + GELU + w_out for one tile of tm merged rows.

    The k*k source tokens of each merged row are gathered directly from x in HBM
    (k DMAs per merged row, each a contiguous (k, 1, d) run) into `gbuf`, so the
    activation is read from HBM exactly once.
    """
    k2 = k * k
    base = pl.program_id(0) * tm

    # ---- in-kernel gather -------------------------------------------------------------
    # TODO(synk): further coalesce DMAs per image block-row and double-buffer the gather
    # across grid steps to hide issuance latency behind the previous tile's matmuls.
    def _issue(r, carry):
        for kr in range(k):                                     # static unroll (k is tiny)
            start = starts_ref[(base + r) * k + kr]
            pltpu.make_async_copy(
                x_hbm.at[pl.ds(start, k)],                      # (k, 1, d) run in HBM
                gbuf.at[pl.ds(kr * k, k), pl.ds(r, 1)],         # chunks kr*k .. kr*k+k-1
                sem,
            ).start()
        return carry
    jax.lax.fori_loop(0, tm, _issue, 0)

    def _drain(r, carry):
        for _ in range(k):                                      # one wait per issued copy
            pltpu.make_async_copy(
                x_hbm.at[pl.ds(0, k)], gbuf.at[pl.ds(0, k), pl.ds(0, 1)], sem,
            ).wait()
        return carry
    jax.lax.fori_loop(0, tm, _drain, 0)

    # ---- RMSNorm (f32 stats) + merging matmul, one (tm, d) chunk at a time -------------
    # ln_w is already folded into wm, so the chunk only needs the rsqrt scale.
    h = jnp.zeros((tm, d), jnp.float32)
    for c in range(k2):                                         # static unroll
        xc = gbuf[c]                                            # (tm, d) f32
        ms = jnp.mean(xc * xc, axis=-1, keepdims=True)          # f32 statistics
        xn = (xc * jax.lax.rsqrt(ms + eps)).astype(jnp.bfloat16)
        h = h + jnp.dot(xn, wm_ref[c * d:(c + 1) * d, :],
                        preferred_element_type=jnp.float32)

    z = jnp.dot(h.astype(jnp.bfloat16), win_ref[...], preferred_element_type=jnp.float32)
    z = _gelu_exact(z)                                          # exact GELU, f32
    o_ref[...] = jnp.dot(z.astype(jnp.bfloat16), wout_ref[...],
                         preferred_element_type=jnp.float32).astype(o_ref.dtype)


def _adapter_plain_kernel(x_ref, win_ref, wout_ref, o_ref):
    """w_out(gelu(w_in(x))) for one row tile (spatial_merge_size == 1 path)."""
    x = x_ref[...].astype(jnp.bfloat16)                         # cast in-kernel (x is f32 in HBM)
    z = jnp.dot(x, win_ref[...], preferred_element_type=jnp.float32)
    z = _gelu_exact(z)
    o_ref[...] = jnp.dot(z.astype(jnp.bfloat16), wout_ref[...],
                         preferred_element_type=jnp.float32).astype(o_ref.dtype)


# ------------------------------------------------------------------
# pallas_call wrappers (grid over merged-token rows, weights VMEM-resident).
# ------------------------------------------------------------------
def _fused_adapter_merge(x, starts, wm_tok, w_in, w_out, *, k, eps=1e-5, row_tile=256):
    """x: (N_tokens, D) f32 (stays in HBM); starts: (M, k) int32 run-start token rows."""
    N, D = x.shape
    DO = w_in.shape[1]
    k2 = k * k
    M = starts.shape[0]

    tm = _pick_tile(M, row_tile)
    Mp = _round_up(max(M, 1), tm)
    grid_m = Mp // tm

    # 1-D scalar-prefetch table (SMEM): start token of each of the k runs per merged row.
    starts_flat = np.zeros((Mp * k,), np.int32)
    starts_flat[: M * k] = np.asarray(starts, np.int32).reshape(-1)   # padded rows gather row 0

    x3 = x.reshape(N, 1, D)   # rank-3 view so gather DMAs are pure-slice (no squeezed dims)

    flops = 2 * Mp * (k2 * D * D + D * DO + DO * DO)
    bytes_acc = Mp * k2 * D * 4 + Mp * DO * 2 + (k2 * D * D + D * DO + DO * DO) * 2
    weight_bytes = 2 * (k2 * D * D + D * DO + DO * DO) * 2            # bf16, x2 buffers
    act_bytes = k2 * tm * D * 4 + 2 * tm * DO * 2 + (8 << 20)         # gather buf + out tiles + slack
    vmem_limit = int(min(max(weight_bytes + act_bytes, 32 << 20), 64 << 20))

    out = pl.pallas_call(
        functools.partial(_adapter_merge_kernel, k=k, d=D, tm=tm, eps=eps),
        out_shape=jax.ShapeDtypeStruct((Mp, DO), jnp.bfloat16),
        grid_spec=pltpu.PrefetchScalarGridSpec(
            num_scalar_prefetch=1,
            grid=(grid_m,),
            in_specs=[
                pl.BlockSpec(memory_space=pl.ANY),                 # x stays in HBM (manual gather)
                # TODO(synk): N/K-tile w_in/w_out with an f32 scratch accumulator (or at least
                # pipeline_mode=pl.Buffered(1)) for production dec_hidden (~5k) on v7x.
                pl.BlockSpec((k2 * D, D), lambda i, s: (0, 0)),    # constant index -> loaded once
                pl.BlockSpec((D, DO), lambda i, s: (0, 0)),
                pl.BlockSpec((DO, DO), lambda i, s: (0, 0)),
            ],
            out_specs=pl.BlockSpec((tm, DO), lambda i, s: (i, 0)),
            scratch_shapes=[
                pltpu.VMEM((k2, tm, D), jnp.float32),              # gather buffer (f32 = x dtype)
                pltpu.SemaphoreType.DMA,
            ],
        ),
        compiler_params=pltpu.CompilerParams(
            dimension_semantics=("parallel",),
            vmem_limit_bytes=vmem_limit,
        ),
        cost_estimate=pl.CostEstimate(flops=int(flops), transcendentals=int(Mp * DO),
                                      bytes_accessed=int(bytes_acc)),
    )(jnp.asarray(starts_flat), x3, wm_tok, w_in, w_out)
    return out[:M]


def _fused_adapter_plain(x, w_in, w_out, *, row_tile=256):
    M, D = x.shape
    DO = w_in.shape[1]
    tm = _pick_tile(M, row_tile)
    Mp = _round_up(max(M, 1), tm)
    if Mp != M:
        x = jnp.pad(x, ((0, Mp - M), (0, 0)))

    flops = 2 * Mp * (D * DO + DO * DO)
    bytes_acc = Mp * D * 4 + Mp * DO * 2 + (D * DO + DO * DO) * 2
    weight_bytes = 2 * (D * DO + DO * DO) * 2
    act_bytes = 2 * tm * D * 4 + 2 * tm * DO * 2 + (8 << 20)
    vmem_limit = int(min(max(weight_bytes + act_bytes, 32 << 20), 64 << 20))

    out = pl.pallas_call(
        _adapter_plain_kernel,
        out_shape=jax.ShapeDtypeStruct((Mp, DO), jnp.bfloat16),
        grid=(Mp // tm,),
        in_specs=[
            pl.BlockSpec((tm, D), lambda i: (i, 0)),
            pl.BlockSpec((D, DO), lambda i: (0, 0)),
            pl.BlockSpec((DO, DO), lambda i: (0, 0)),
        ],
        out_specs=pl.BlockSpec((tm, DO), lambda i: (i, 0)),
        compiler_params=pltpu.CompilerParams(
            dimension_semantics=("parallel",),
            vmem_limit_bytes=vmem_limit,
        ),
        cost_estimate=pl.CostEstimate(flops=int(flops), transcendentals=int(Mp * DO),
                                      bytes_accessed=int(bytes_acc)),
    )(x, w_in, w_out)
    return out[:M]


# ------------------------------------------------------------------
# Full VisionLanguageAdapter forward.
# ------------------------------------------------------------------
def vision_language_adapter_forward(params, x, image_sizes, cfg, *, row_tile=256):
    """x: (N_tokens, enc_hidden) f32 image features; image_sizes: list of (H, W) in pixels."""
    D = cfg["enc_hidden"]
    k = cfg["spatial_merge_size"]
    P = cfg["patch_size"]
    w_in = params["w_in"].astype(jnp.bfloat16)
    w_out = params["w_out"].astype(jnp.bfloat16)

    if k > 1:
        k2 = k * k
        # Static host-side index table reproducing F.unfold(kernel=stride=k): merged rows
        # ordered row-major over (block_row, block_col) per image; for each merged row, run kr
        # starts at token (block_row*k + kr)*wp + block_col*k and covers patches p = kr*k..kr*k+k-1.
        starts_list, off = [], 0
        for (H, W) in image_sizes:
            hp, wp = H // P, W // P
            hb, wb = hp // k, wp // k
            br, bc, kr = np.arange(hb), np.arange(wb), np.arange(k)
            s = ((br[:, None, None] * k + kr[None, None, :]) * wp
                 + bc[None, :, None] * k) + off                           # (hb, wb, k)
            starts_list.append(s.reshape(-1, k))
            off += hp * wp
        starts = np.concatenate(starts_list, axis=0).astype(np.int32)     # (M, k)

        # Fold (a) F.unfold's channel-major column order (col = ch*k2 + p) and (b) the RMSNorm
        # gain ln_w into the merging weight ONCE, offline: token-major input row j_t = p*D + ch
        # reads weight row j_c = ch*k2 + p scaled by ln_w[ch].
        jt = np.arange(k2 * D)
        perm = (jt % D) * k2 + (jt // D)
        ln_tiled = jnp.tile(params["ln_w"].astype(jnp.float32), k2)[:, None]
        wm_tok = (params["w_merge"][jnp.asarray(perm)] * ln_tiled).astype(jnp.bfloat16)

        out = _fused_adapter_merge(x, starts, wm_tok, w_in, w_out,
                                   k=k, eps=1e-5, row_tile=row_tile)
    else:
        out = _fused_adapter_plain(x, w_in, w_out, row_tile=row_tile)

    return out[None]     # PyTorch carries a leading batch dim of 1


# ------------------------------------------------------------------
# Pure-JAX reference mirroring the PyTorch module (f32 throughout).
# ------------------------------------------------------------------
def reference_forward(params, x, image_sizes, cfg):
    D = cfg["enc_hidden"]
    k = cfg["spatial_merge_size"]
    P = cfg["patch_size"]
    h = x
    if k > 1:
        ms = jnp.mean(x * x, axis=-1, keepdims=True)
        xn = x * jax.lax.rsqrt(ms + 1e-5) * params["ln_w"][None, :]          # RMSNorm
        rows, off = [], 0
        for (H, W) in image_sizes:                                           # PatchMerger
            hp, wp = H // P, W // P
            tok = xn[off:off + hp * wp]
            off += hp * wp
            grid = tok.reshape(hp, wp, D).transpose(2, 0, 1)                 # (D, hp, wp)
            g = grid.reshape(D, hp // k, k, wp // k, k).transpose(1, 3, 0, 2, 4)
            rows.append(g.reshape(-1, D * k * k))                            # == F.unfold(...).T
        h = jnp.concatenate(rows, axis=0) @ params["w_merge"]                # merging_layer
    z = h @ params["w_in"]
    z = 0.5 * z * (1.0 + jax.lax.erf(z * _INV_SQRT2))                        # exact GELU
    return (z @ params["w_out"])[None]


# ------------------------------------------------------------------
# Deterministic synthetic parameters (shapes follow the module __init__).
# ------------------------------------------------------------------
def init_params(key, cfg):
    D = cfg["enc_hidden"]
    DO = cfg["dec_hidden"]
    k = cfg["spatial_merge_size"]
    k0, k1, k2, k3 = jax.random.split(key, 4)
    scale = 0.02
    params = {
        "w_in": scale * jax.random.normal(k0, (D, DO), jnp.float32),    # Linear(in,out,bias=False).T
        "w_out": scale * jax.random.normal(k1, (DO, DO), jnp.float32),
    }
    if k > 1:
        params["ln_w"] = 1.0 + 0.1 * jax.random.normal(k2, (D,), jnp.float32)
        # merging_layer weight stored as (k²·D, D): rows in PyTorch's channel-major
        # unfold order (== nn.Linear weight transposed).
        params["w_merge"] = scale * jax.random.normal(k3, (k * k * D, D), jnp.float32)
    return params


if __name__ == "__main__":
    cfg = dict(enc_hidden=128, dec_hidden=256, spatial_merge_size=2, patch_size=16)
    key = jax.random.PRNGKey(0)
    kx, kp = jax.random.split(key)

    # Two variable-size images (pixels): (128,128) -> 8x8 patches, (64,128) -> 4x8 patches.
    image_sizes = [(128, 128), (64, 128)]
    n_tokens = sum((H // cfg["patch_size"]) * (W // cfg["patch_size"]) for H, W in image_sizes)
    x = jax.random.normal(kx, (n_tokens, cfg["enc_hidden"]), jnp.float32)     # (96, 128)
    params = init_params(kp, cfg)

    # --- merge path (spatial_merge_size=2): RMSNorm + PatchMerger + MLP, fused ---
    out = vision_language_adapter_forward(params, x, image_sizes, cfg)
    out = jax.block_until_ready(out)
    n_merged = sum((H // cfg["patch_size"] // 2) * (W // cfg["patch_size"] // 2)
                   for H, W in image_sizes)                                   # 16 + 8 = 24
    assert out.shape == (1, n_merged, cfg["dec_hidden"])
    ref = reference_forward(params, x, image_sizes, cfg)
    err = float(jnp.max(jnp.abs(out.astype(jnp.float32) - ref)))
    assert err < 5e-3, f"merge-path mismatch vs reference: max abs err {err}"

    # --- plain path (spatial_merge_size=1): w_out(gelu(w_in(x))) only ---
    cfg_plain = dict(cfg, spatial_merge_size=1)
    out2 = vision_language_adapter_forward(params, x, image_sizes, cfg_plain)
    out2 = jax.block_until_ready(out2)
    assert out2.shape == (1, n_tokens, cfg["dec_hidden"])
    ref2 = reference_forward(params, x, image_sizes, cfg_plain)
    err2 = float(jnp.max(jnp.abs(out2.astype(jnp.float32) - ref2)))
    assert err2 < 5e-3, f"plain-path mismatch vs reference: max abs err {err2}"

    print("KERNEL_OK")
</pallas_src>

<mosaic_0001>
module attributes {stable_mosaic.version = 11 : i64} {
  func.func @_adapter_merge_kernel(%arg0: i32, %arg1: memref<64xi32, #tpu.memory_space<smem>>, %arg2: memref<96x1x128xf32, #tpu.memory_space<any>>, %arg3: memref<512x128xbf16, #tpu.memory_space<vmem>>, %arg4: memref<128x256xbf16, #tpu.memory_space<vmem>>, %arg5: memref<256x256xbf16, #tpu.memory_space<vmem>>, %arg6: memref<16x256xbf16, #tpu.memory_space<vmem>>, %arg7: memref<4x16x128xf32, #tpu.memory_space<vmem>>, %arg8: memref<!tpu.dma_semaphore, #tpu.memory_space<semaphore_mem>>) attributes {dimension_semantics = [#tpu.dimension_semantics<parallel>], iteration_bounds = array<i64: 2>, scalar_prefetch = 1 : i64, scratch_operands = 2 : i64, tpu.core_type = #tpu.core_type<tc>, window_params = [{}, {pipeline_mode = #tpu.pipeline_mode<synchronous>, transform_indices = @transform_1, window_bounds = array<i64: 512, 128>}, {pipeline_mode = #tpu.pipeline_mode<synchronous>, transform_indices = @transform_2, window_bounds = array<i64: 128, 256>}, {pipeline_mode = #tpu.pipeline_mode<synchronous>, transform_indices = @transform_3, window_bounds = array<i64: 256, 256>}, {transform_indices = @transform_4, window_bounds = array<i64: 16, 256>}]} {
    %c16_i32 = arith.constant 16 : i32
    %0 = arith.muli %arg0, %c16_i32 : i32
    %c0_i32 = arith.constant 0 : i32
    %c16_i32_0 = arith.constant 16 : i32
    %1 = arith.addi %c0_i32, %c16_i32_0 : i32
    %c1_i32 = arith.constant 1 : i32
    scf.for %arg9 = %c0_i32 to %1 step %c1_i32  : i32 {
      %115 = arith.addi %0, %arg9 : i32
      %c2_i32 = arith.constant 2 : i32
      %116 = arith.muli %115, %c2_i32 : i32
      %c0_i32_56 = arith.constant 0 : i32
      %117 = arith.addi %116, %c0_i32_56 : i32
      %118 = arith.index_cast %117 : i32 to index
      %119 = memref.load %arg1[%118] : memref<64xi32, #tpu.memory_space<smem>>
      %c0_i32_57 = arith.constant 0 : i32
      %c0_i32_58 = arith.constant 0 : i32
      %120 = tpu.memref_slice %arg2[%119, %c0_i32_57, %c0_i32_58] : memref<96x1x128xf32, #tpu.memory_space<any>> -> memref<2x1x128xf32, #tpu.memory_space<any>>
      %c0_i32_59 = arith.constant 0 : i32
      %c0_i32_60 = arith.constant 0 : i32
      %121 = tpu.memref_slice %arg7[%c0_i32_59, %arg9, %c0_i32_60] : memref<4x16x128xf32, #tpu.memory_space<vmem>> -> memref<2x1x128xf32, #tpu.memory_space<vmem>>
      tpu.enqueue_dma source(%120 : memref<2x1x128xf32, #tpu.memory_space<any>>) target(%121 : memref<2x1x128xf32, #tpu.memory_space<vmem>>) target_semaphore(%arg8 : memref<!tpu.dma_semaphore, #tpu.memory_space<semaphore_mem>>)
      %122 = arith.addi %0, %arg9 : i32
      %c2_i32_61 = arith.constant 2 : i32
      %123 = arith.muli %122, %c2_i32_61 : i32
      %c1_i32_62 = arith.constant 1 : i32
      %124 = arith.addi %123, %c1_i32_62 : i32
      %125 = arith.index_cast %124 : i32 to index
      %126 = memref.load %arg1[%125] : memref<64xi32, #tpu.memory_space<smem>>
      %c0_i32_63 = arith.constant 0 : i32
      %c0_i32_64 = arith.constant 0 : i32
      %127 = tpu.memref_slice %arg2[%126, %c0_i32_63, %c0_i32_64] : memref<96x1x128xf32, #tpu.memory_space<any>> -> memref<2x1x128xf32, #tpu.memory_space<any>>
      %c2_i32_65 = arith.constant 2 : i32
      %c0_i32_66 = arith.constant 0 : i32
      %128 = tpu.memref_slice %arg7[%c2_i32_65, %arg9, %c0_i32_66] : memref<4x16x128xf32, #tpu.memory_space<vmem>> -> memref<2x1x128xf32, #tpu.memory_space<vmem>>
      tpu.enqueue_dma source(%127 : memref<2x1x128xf32, #tpu.memory_space<any>>) target(%128 : memref<2x1x128xf32, #tpu.memory_space<vmem>>) target_semaphore(%arg8 : memref<!tpu.dma_semaphore, #tpu.memory_space<semaphore_mem>>)
    }
    %c16_i32_1 = arith.constant 16 : i32
    %c0_i32_2 = arith.constant 0 : i32
    %c16_i32_3 = arith.constant 16 : i32
    %2 = arith.addi %c0_i32_2, %c16_i32_3 : i32
    %c1_i32_4 = arith.constant 1 : i32
    scf.for %arg9 = %c0_i32_2 to %2 step %c1_i32_4  : i32 {
      %c0_i32_56 = arith.constant 0 : i32
      %c0_i32_57 = arith.constant 0 : i32
      %c0_i32_58 = arith.constant 0 : i32
      %115 = tpu.memref_slice %arg2[%c0_i32_56, %c0_i32_57, %c0_i32_58] : memref<96x1x128xf32, #tpu.memory_space<any>> -> memref<2x1x128xf32, #tpu.memory_space<any>>
      %c0_i32_59 = arith.constant 0 : i32
      %c0_i32_60 = arith.constant 0 : i32
      %c0_i32_61 = arith.constant 0 : i32
      %116 = tpu.memref_slice %arg7[%c0_i32_59, %c0_i32_60, %c0_i32_61] : memref<4x16x128xf32, #tpu.memory_space<vmem>> -> memref<2x1x128xf32, #tpu.memory_space<vmem>>
      tpu.wait_dma2 semaphore(%arg8 : memref<!tpu.dma_semaphore, #tpu.memory_space<semaphore_mem>>) src(%115 : memref<2x1x128xf32, #tpu.memory_space<any>>) dst(%116 : memref<2x1x128xf32, #tpu.memory_space<vmem>>)
      %c0_i32_62 = arith.constant 0 : i32
      %c0_i32_63 = arith.constant 0 : i32
      %c0_i32_64 = arith.constant 0 : i32
      %117 = tpu.memref_slice %arg2[%c0_i32_62, %c0_i32_63, %c0_i32_64] : memref<96x1x128xf32, #tpu.memory_space<any>> -> memref<2x1x128xf32, #tpu.memory_space<any>>
      %c0_i32_65 = arith.constant 0 : i32
      %c0_i32_66 = arith.constant 0 : i32
      %c0_i32_67 = arith.constant 0 : i32
      %118 = tpu.memref_slice %arg7[%c0_i32_65, %c0_i32_66, %c0_i32_67] : memref<4x16x128xf32, #tpu.memory_space<vmem>> -> memref<2x1x128xf32, #tpu.memory_space<vmem>>
      tpu.wait_dma2 semaphore(%arg8 : memref<!tpu.dma_semaphore, #tpu.memory_space<semaphore_mem>>) src(%117 : memref<2x1x128xf32, #tpu.memory_space<any>>) dst(%118 : memref<2x1x128xf32, #tpu.memory_space<vmem>>)
    }
    %cst = arith.constant 0.000000e+00 : f32
    %3 = vector.broadcast %cst : f32 to vector<16x128xf32>
    %c0 = arith.constant 0 : index
    %c0_5 = arith.constant 0 : index
    %c0_6 = arith.constant 0 : index
    %4 = vector.load %arg7[%c0, %c0_5, %c0_6] : memref<4x16x128xf32, #tpu.memory_space<vmem>>, vector<1x16x128xf32>
    %5 = vector.shape_cast %4 : vector<1x16x128xf32> to vector<16x128xf32>
    %6 = arith.mulf %5, %5 : vector<16x128xf32>
    %cst_7 = arith.constant dense<0.000000e+00> : vector<16xf32>
    %7 = vector.multi_reduction <add>, %6, %cst_7 [1] : vector<16x128xf32> to vector<16xf32>
    %8 = vector.shape_cast %7 : vector<16xf32> to vector<16x1xf32>
    %cst_8 = arith.constant 1.280000e+02 : f32
    %9 = vector.broadcast %cst_8 : f32 to vector<16x1xf32>
    %10 = arith.divf %8, %9 : vector<16x1xf32>
    %cst_9 = arith.constant 9.99999974E-6 : f32
    %11 = vector.broadcast %cst_9 : f32 to vector<16x1xf32>
    %12 = arith.addf %10, %11 : vector<16x1xf32>
    %13 = math.rsqrt %12 : vector<16x1xf32>
    %14 = vector.broadcast %13 : vector<16x1xf32> to vector<16x128xf32>
    %15 = arith.mulf %5, %14 : vector<16x128xf32>
    %16 = arith.truncf %15 : vector<16x128xf32> to vector<16x128xbf16>
    %c0_10 = arith.constant 0 : index
    %c0_11 = arith.constant 0 : index
    %17 = vector.load %arg3[%c0_10, %c0_11] : memref<512x128xbf16, #tpu.memory_space<vmem>>, vector<128x128xbf16>
    %cst_12 = arith.constant dense<0.000000e+00> : vector<16x128xf32>
    %18 = tpu.matmul %16, %17, %cst_12 {dimension_numbers = #tpu.dot_dimension_numbers<[1], [0], [0], [1], [0, 0, 1, 1], [], []>} : vector<16x128xbf16>, vector<128x128xbf16>, vector<16x128xf32> -> vector<16x128xf32>
    %19 = arith.addf %3, %18 : vector<16x128xf32>
    %c1 = arith.constant 1 : index
    %c0_13 = arith.constant 0 : index
    %c0_14 = arith.constant 0 : index
    %20 = vector.load %arg7[%c1, %c0_13, %c0_14] : memref<4x16x128xf32, #tpu.memory_space<vmem>>, vector<1x16x128xf32>
    %21 = vector.shape_cast %20 : vector<1x16x128xf32> to vector<16x128xf32>
    %22 = arith.mulf %21, %21 : vector<16x128xf32>
    %cst_15 = arith.constant dense<0.000000e+00> : vector<16xf32>
    %23 = vector.multi_reduction <add>, %22, %cst_15 [1] : vector<16x128xf32> to vector<16xf32>
    %24 = vector.shape_cast %23 : vector<16xf32> to vector<16x1xf32>
    %cst_16 = arith.constant 1.280000e+02 : f32
    %25 = vector.broadcast %cst_16 : f32 to vector<16x1xf32>
    %26 = arith.divf %24, %25 : vector<16x1xf32>
    %cst_17 = arith.constant 9.99999974E-6 : f32
    %27 = vector.broadcast %cst_17 : f32 to vector<16x1xf32>
    %28 = arith.addf %26, %27 : vector<16x1xf32>
    %29 = math.rsqrt %28 : vector<16x1xf32>
    %30 = vector.broadcast %29 : vector<16x1xf32> to vector<16x128xf32>
    %31 = arith.mulf %21, %30 : vector<16x128xf32>
    %32 = arith.truncf %31 : vector<16x128xf32> to vector<16x128xbf16>
    %c128 = arith.constant 128 : index
    %c0_18 = arith.constant 0 : index
    %33 = vector.load %arg3[%c128, %c0_18] : memref<512x128xbf16, #tpu.memory_space<vmem>>, vector<128x128xbf16>
    %cst_19 = arith.constant dense<0.000000e+00> : vector<16x128xf32>
    %34 = tpu.matmul %32, %33, %cst_19 {dimension_numbers = #tpu.dot_dimension_numbers<[1], [0], [0], [1], [0, 0, 1, 1], [], []>} : vector<16x128xbf16>, vector<128x128xbf16>, vector<16x128xf32> -> vector<16x128xf32>
    %35 = arith.addf %19, %34 : vector<16x128xf32>
    %c2 = arith.constant 2 : index
    %c0_20 = arith.constant 0 : index
    %c0_21 = arith.constant 0 : index
    %36 = vector.load %arg7[%c2, %c0_20, %c0_21] : memref<4x16x128xf32, #tpu.memory_space<vmem>>, vector<1x16x128xf32>
    %37 = vector.shape_cast %36 : vector<1x16x128xf32> to vector<16x128xf32>
    %38 = arith.mulf %37, %37 : vector<16x128xf32>
    %cst_22 = arith.constant dense<0.000000e+00> : vector<16xf32>
    %39 = vector.multi_reduction <add>, %38, %cst_22 [1] : vector<16x128xf32> to vector<16xf32>
    %40 = vector.shape_cast %39 : vector<16xf32> to vector<16x1xf32>
    %cst_23 = arith.constant 1.280000e+02 : f32
    %41 = vector.broadcast %cst_23 : f32 to vector<16x1xf32>
    %42 = arith.divf %40, %41 : vector<16x1xf32>
    %cst_24 = arith.constant 9.99999974E-6 : f32
    %43 = vector.broadcast %cst_24 : f32 to vector<16x1xf32>
    %44 = arith.addf %42, %43 : vector<16x1xf32>
    %45 = math.rsqrt %44 : vector<16x1xf32>
    %46 = vector.broadcast %45 : vector<16x1xf32> to vector<16x128xf32>
    %47 = arith.mulf %37, %46 : vector<16x128xf32>
    %48 = arith.truncf %47 : vector<16x128xf32> to vector<16x128xbf16>
    %c256 = arith.constant 256 : index
    %c0_25 = arith.constant 0 : index
    %49 = vector.load %arg3[%c256, %c0_25] : memref<512x128xbf16, #tpu.memory_space<vmem>>, vector<128x128xbf16>
    %cst_26 = arith.constant dense<0.000000e+00> : vector<16x128xf32>
    %50 = tpu.matmul %48, %49, %cst_26 {dimension_numbers = #tpu.dot_dimension_numbers<[1], [0], [0], [1], [0, 0, 1, 1], [], []>} : vector<16x128xbf16>, vector<128x128xbf16>, vector<16x128xf32> -> vector<16x128xf32>
    %51 = arith.addf %35, %50 : vector<16x128xf32>
    %c3 = arith.constant 3 : index
    %c0_27 = arith.constant 0 : index
    %c0_28 = arith.constant 0 : index
    %52 = vector.load %arg7[%c3, %c0_27, %c0_28] : memref<4x16x128xf32, #tpu.memory_space<vmem>>, vector<1x16x128xf32>
    %53 = vector.shape_cast %52 : vector<1x16x128xf32> to vector<16x128xf32>
    %54 = arith.mulf %53, %53 : vector<16x128xf32>
    %cst_29 = arith.constant dense<0.000000e+00> : vector<16xf32>
    %55 = vector.multi_reduction <add>, %54, %cst_29 [1] : vector<16x128xf32> to vector<16xf32>
    %56 = vector.shape_cast %55 : vector<16xf32> to vector<16x1xf32>
    %cst_30 = arith.constant 1.280000e+02 : f32
    %57 = vector.broadcast %cst_30 : f32 to vector<16x1xf32>
    %58 = arith.divf %56, %57 : vector<16x1xf32>
    %cst_31 = arith.constant 9.99999974E-6 : f32
    %59 = vector.broadcast %cst_31 : f32 to vector<16x1xf32>
    %60 = arith.addf %58, %59 : vector<16x1xf32>
    %61 = math.rsqrt %60 : vector<16x1xf32>
    %62 = vector.broadcast %61 : vector<16x1xf32> to vector<16x128xf32>
    %63 = arith.mulf %53, %62 : vector<16x128xf32>
    %64 = arith.truncf %63 : vector<16x128xf32> to vector<16x128xbf16>
    %c384 = arith.constant 384 : index
    %c0_32 = arith.constant 0 : index
    %65 = vector.load %arg3[%c384, %c0_32] : memref<512x128xbf16, #tpu.memory_space<vmem>>, vector<128x128xbf16>
    %cst_33 = arith.constant dense<0.000000e+00> : vector<16x128xf32>
    %66 = tpu.matmul %64, %65, %cst_33 {dimension_numbers = #tpu.dot_dimension_numbers<[1], [0], [0], [1], [0, 0, 1, 1], [], []>} : vector<16x128xbf16>, vector<128x128xbf16>, vector<16x128xf32> -> vector<16x128xf32>
    %67 = arith.addf %51, %66 : vector<16x128xf32>
    %68 = arith.truncf %67 : vector<16x128xf32> to vector<16x128xbf16>
    %c0_34 = arith.constant 0 : index
    %c0_35 = arith.constant 0 : index
    %69 = vector.load %arg4[%c0_34, %c0_35] : memref<128x256xbf16, #tpu.memory_space<vmem>>, vector<128x256xbf16>
    %cst_36 = arith.constant dense<0.000000e+00> : vector<16x256xf32>
    %70 = tpu.matmul %68, %69, %cst_36 {dimension_numbers = #tpu.dot_dimension_numbers<[1], [0], [0], [1], [0, 0, 1, 1], [], []>} : vector<16x128xbf16>, vector<128x256xbf16>, vector<16x256xf32> -> vector<16x256xf32>
    %cst_37 = arith.constant 5.000000e-01 : f32
    %71 = vector.broadcast %cst_37 : f32 to vector<16x256xf32>
    %72 = arith.mulf %71, %70 : vector<16x256xf32>
    %cst_38 = arith.constant 0.707106769 : f32
    %73 = vector.broadcast %cst_38 : f32 to vector<16x256xf32>
    %74 = arith.mulf %70, %73 : vector<16x256xf32>
    %75 = math.absf %74 : vector<16x256xf32>
    %cst_39 = arith.constant 0.327591091 : f32
    %76 = vector.broadcast %cst_39 : f32 to vector<16x256xf32>
    %77 = arith.mulf %76, %75 : vector<16x256xf32>
    %cst_40 = arith.constant 1.000000e+00 : f32
    %78 = vector.broadcast %cst_40 : f32 to vector<16x256xf32>
    %79 = arith.addf %78, %77 : vector<16x256xf32>
    %80 = tpu.reciprocal %79 {approx = true} : vector<16x256xf32> -> vector<16x256xf32>
    %cst_41 = arith.constant 1.06140542 : f32
    %81 = vector.broadcast %cst_41 : f32 to vector<16x256xf32>
    %82 = arith.mulf %80, %81 : vector<16x256xf32>
    %cst_42 = arith.constant -1.45315206 : f32
    %83 = vector.broadcast %cst_42 : f32 to vector<16x256xf32>
    %84 = arith.addf %83, %82 : vector<16x256xf32>
    %85 = arith.mulf %80, %84 : vector<16x256xf32>
    %cst_43 = arith.constant 1.42141378 : f32
    %86 = vector.broadcast %cst_43 : f32 to vector<16x256xf32>
    %87 = arith.addf %86, %85 : vector<16x256xf32>
    %88 = arith.mulf %80, %87 : vector<16x256xf32>
    %cst_44 = arith.constant -0.284496725 : f32
    %89 = vector.broadcast %cst_44 : f32 to vector<16x256xf32>
    %90 = arith.addf %89, %88 : vector<16x256xf32>
    %91 = arith.mulf %80, %90 : vector<16x256xf32>
    %cst_45 = arith.constant 0.254829586 : f32
    %92 = vector.broadcast %cst_45 : f32 to vector<16x256xf32>
    %93 = arith.addf %92, %91 : vector<16x256xf32>
    %94 = arith.mulf %80, %93 : vector<16x256xf32>
    %cst_46 = arith.constant 0.000000e+00 : f32
    %95 = vector.broadcast %cst_46 : f32 to vector<16x256xf32>
    %96 = arith.subf %95, %75 : vector<16x256xf32>
    %97 = arith.mulf %96, %75 : vector<16x256xf32>
    %98 = math.exp %97 : vector<16x256xf32>
    %99 = arith.mulf %94, %98 : vector<16x256xf32>
    %cst_47 = arith.constant 1.000000e+00 : f32
    %100 = vector.broadcast %cst_47 : f32 to vector<16x256xf32>
    %101 = arith.subf %100, %99 : vector<16x256xf32>
    %cst_48 = arith.constant 0.000000e+00 : f32
    %102 = vector.broadcast %cst_48 : f32 to vector<16x256xf32>
    %103 = arith.cmpf oge, %74, %102 : vector<16x256xf32>
    %cst_49 = arith.constant 0.000000e+00 : f32
    %104 = vector.broadcast %cst_49 : f32 to vector<16x256xf32>
    %105 = arith.subf %104, %101 : vector<16x256xf32>
    %106 = arith.select %103, %101, %105 : vector<16x256xi1>, vector<16x256xf32>
    %cst_50 = arith.constant 1.000000e+00 : f32
    %107 = vector.broadcast %cst_50 : f32 to vector<16x256xf32>
    %108 = arith.addf %107, %106 : vector<16x256xf32>
    %109 = arith.mulf %72, %108 : vector<16x256xf32>
    %110 = arith.truncf %109 : vector<16x256xf32> to vector<16x256xbf16>
    %c0_51 = arith.constant 0 : index
    %c0_52 = arith.constant 0 : index
    %111 = vector.load %arg5[%c0_51, %c0_52] : memref<256x256xbf16, #tpu.memory_space<vmem>>, vector<256x256xbf16>
    %cst_53 = arith.constant dense<0.000000e+00> : vector<16x256xf32>
    %112 = tpu.matmul %110, %111, %cst_53 {dimension_numbers = #tpu.dot_dimension_numbers<[1], [0], [0], [1], [0, 0, 1, 1], [], []>} : vector<16x256xbf16>, vector<256x256xbf16>, vector<16x256xf32> -> vector<16x256xf32>
    %113 = arith.truncf %112 : vector<16x256xf32> to vector<16x256xbf16>
    %c0_54 = arith.constant 0 : index
    %c0_55 = arith.constant 0 : index
    %114 = vector.load %arg6[%c0_54, %c0_55] : memref<16x256xbf16, #tpu.memory_space<vmem>>, vector<16x256xbf16>
    tpu.vector_store %arg6[%c0_54, %c0_55], %113 {strides = array<i32>} : memref<16x256xbf16, #tpu.memory_space<vmem>>, vector<16x256xbf16>,
    return
  }
  func.func @transform_1(%arg0: i32, %arg1: memref<64xi32, #tpu.memory_space<smem>>) -> (i32, i32) {
    %c0_i32 = arith.constant 0 : i32
    %c0_i32_0 = arith.constant 0 : i32
    %c0_i32_1 = arith.constant 0 : i32
    return %c0_i32, %c0_i32_0 : i32, i32
  }
  func.func @transform_2(%arg0: i32, %arg1: memref<64xi32, #tpu.memory_space<smem>>) -> (i32, i32) {
    %c0_i32 = arith.constant 0 : i32
    %c0_i32_0 = arith.constant 0 : i32
    %c0_i32_1 = arith.constant 0 : i32
    return %c0_i32, %c0_i32_0 : i32, i32
  }
  func.func @transform_3(%arg0: i32, %arg1: memref<64xi32, #tpu.memory_space<smem>>) -> (i32, i32) {
    %c0_i32 = arith.constant 0 : i32
    %c0_i32_0 = arith.constant 0 : i32
    %c0_i32_1 = arith.constant 0 : i32
    return %c0_i32, %c0_i32_0 : i32, i32
  }
  func.func @transform_4(%arg0: i32, %arg1: memref<64xi32, #tpu.memory_space<smem>>) -> (i32, i32) {
    %c0_i32 = arith.constant 0 : i32
    %c0_i32_0 = arith.constant 0 : i32
    return %arg0, %c0_i32 : i32, i32
  }
}

</mosaic_0001>

<bundles_post_ra>
// kernel: tpu_custom_call.1
= control target key start
LH: loop header
LB: loop body
LE: loop exit
PB: predicated region body
PF: predicated region fallthrough
CT: control target
= control target key end

     0   :  { %s2481_s0 = inlined_call_operand.hbm [shape: s32[64], index: 0, kind: input, shape index: {}]   ;;  %s2482_s1 = inlined_call_operand.hbm [shape: f32[96,1,128], index: 1, kind: input, shape index: {}]   ;;  %s2483_s2 = inlined_call_operand.hbm [shape: bf16[512,128], index: 2, kind: input, shape index: {}]   ;;  %s2484_s3 = inlined_call_operand.hbm [shape: bf16[128,256], index: 3, kind: input, shape index: {}]   ;;  %s2485_s4 = inlined_call_operand.hbm [shape: bf16[256,256], index: 4, kind: input, shape index: {}]   ;;  %s2486_s5 = inlined_call_operand.hbm [shape: bf16[32,256], index: 5, kind: output, shape index: {}]  }
   0x1   :  { %2493 = sst [smem:[#allocation20_spill]] %s2483_s2  ;;  %s1822_s20 = scalar_lea.hbm %s2481_s0, 16 }
   0x2   :  { %2494 = sst [smem:[#allocation21_spill]] %s2484_s3  ;;  %p1823_p0 = scmp.ne.s32.totalorder %s2481_s0, %s1822_s20 }
   0x3   :  { %2495 = sst [smem:[#allocation22_spill]] %s2485_s4  ;;  %p1826_p1 = scmp.lt.u32.totalorder %s1822_s20, %s2481_s0 }
   0x5   :  { %p1828_p2 = pnand %p1826_p1, %p1823_p0 }
   0x7   :  { %1831 = shalt.err (!%p1828_p2)  }
   0x8   :  { %s2056_s25 = smov [#allocation5]  }
   0x9   :  { %11 = dma.hbm_to_smem %s2481_s0, 16, %s2056_s25, [#allocation4] }
   0xa   :  { %2016 = dma.done.wait [#allocation4], 16 }
   0xb   :  { %2017 = vsyncadd [#allocation4], 4294967280 }
   0xc   :  { %13 = sfence }
   0xd   :  { %14 = vsyncpa [#allocation7], 0 }
   0xe   :  { %15 = vsyncpa [#allocation10], 0 }
   0xf   :  { %16 = vsyncpa [#allocation8], 0 }
  0x10   :  { %18 = vsyncpa [#allocation8 + $0x1], 0  ;;  %s2116_s28 = smov 0   ;;  %s2118_s29 = smov 0  }
  0x11   :  { %s2120_s30 = smov 0   ;;  %s2122_s6 = smov 0  }
  0x12 LB: > { %s2137_s0 = sadd.s32 4294967295, %s2046_s6   ;;  %s1352_s7 = sadd.s32 4294967294, %s2046_s6   ;;  %s2046_s6 = sphi %s2122_s6, %s2518_s6   ;;  %s2042_s30 = sphi %s2120_s30, %s2517_s30   ;;  %s2038_s29 = sphi %s2118_s29, %s2516_s29   ;;  %s2034_s28 = sphi %s2116_s28, %s2515_s28  }
  0x13   : > { %s2141_s8 = sadd.s32 1, %s2046_s6   ;;  %s94_s9 = sadd.s32 1, %s2042_s30 }
  0x14   : > { %s91_s10 = ssub.s32 %s2046_s6, %s2141_s8  ;;  %p104_p3 = scmp.ne.s32.totalorder %s2042_s30, %s2038_s29 }
  0x15   : > { %p92_p4 = scmp.eq.s32.totalorder %s91_s10, 0  ;;  %p105_p5 = scmp.eq.s32.totalorder %s2137_s0, 1 }
  0x16   : > { %p110_p6 = scmp.ne.s32.totalorder %s2038_s29, %s2034_s28  ;;  %p111_p7 = scmp.eq.s32.totalorder %s1352_s7, 1 }
  0x17   : > { %s2152_s11 = scalar_select %p92_p4, %s2042_s30, %s94_s9  }
  0x18   : > { %p2154_p8 = por %p105_p5, %p104_p3  ;;  %p2158_p9 = por %p111_p7, %p110_p6 }
  0x19   : > { %p1353_p10 = scmp.ge.s32.totalorder %s2046_s6, 1  ;;  %p118_p11 = scmp.lt.s32.totalorder %s2046_s6, 3 }
  0x1a   : > { %s2496_s12 = scalar_select %p2154_p8, 1, 0 }
  0x1b   : > { %s2497_s13 = scalar_select %p2158_p9, 1, 0 }
  0x1c   : > { %p2487_p12 = scmp.eq.s32.totalorder %s2137_s0, 0  ;;  %p2165_p13 = pnand %p1353_p10, %p118_p11 }
  0x1d   : > { %s2057_s15 = smov [#allocation9]   ;;  %s2058_s18 = smov [#allocation6]  }
  0x1e   : > { %s2498_s14 = scalar_select %p2165_p13, 1, 0 }
  0x1f   : > { %s143_s16 = sshll.u32 %s2057_s15, 4  ;;  %p1601_p0 = pneg %p2165_p13  ;;  %s144_s16 = int_to_ptr.vmem [resolvable:$true] %s143_s16 }
  0x20   : > { %s130_s19 = sshll.u32 %s2058_s18, 4  ;;  %s2500_s3 = sld [smem:[#allocation21_spill]]  ;;  %s2177_s19 = int_to_ptr.vmem [resolvable:$true] %s130_s19 }
  0x21   : > { %p2173_p1 = pnand %p2487_p12, %p1601_p0 }
  0x23   : > { %p2187_p3 = pneg %p2173_p1 }
  0x26   : > { %s1832_s22 = scalar_lea.hbm %s2500_s3, 2048 }
  0x27   : > { %p1833_p2 = scmp.ne.s32.totalorder %s2500_s3, %s1832_s22  ;;  %p1839_p6 = scmp.lt.u32.totalorder %s1832_s22, %s2500_s3 }
  0x29   : > { %p1835_p4 = pnand %p2187_p3, %p1833_p2 }
  0x2b   : > { %p1836_p5 = pneg %p1835_p4 }
  0x2d   : > { %p1841_p7 = pnand %p1839_p6, %p1836_p5 }
  0x2f   : > { %1844 = shalt.err (!%p1841_p7)
}
  0x30   : > { %s1845_s7 = scalar_lea.vmem %s144_s16, 2048  ;;  %p1853_p12 = scmp.lt.s32.totalorder %s144_s16, %s144_s16 }
  0x31   : > { %p1846_p10 = scmp.ne.s32.totalorder %s144_s16, %s1845_s7  ;;  %p1854_p9 = scmp.lt.s32.totalorder %s1845_s7, %s1845_s7 }
  0x33   : > { %p1848_p11 = pnand %p1846_p10, %p2187_p3  ;;  %p1855_p8 = por %p1854_p9, %p1853_p12 }
  0x35   : > { %p1849_p0 = pneg %p1848_p11 }
  0x37   : > { %p1856_p13 = pnand %p1855_p8, %p1849_p0 }
  0x39   : > { %1859 = shalt.err (!%p1856_p13)
}
  0x3a   : > { %s2490_s9 = smov 128   ;;  %s2491_s10 = smov 8  }
  0x3b   : > { %1607 = dma.hbm_to_vmem [thread:$0]  (!%p2173_p1), %s2500_s3, 2048, %s144_s16, [#allocation10], %s2490_s9, %s2490_s9, %s2491_s10  }
  0x3c   : > { %s2502_s2 = sld [smem:[#allocation20_spill]] }
  0x42   : > { %s1860_s22 = scalar_lea.hbm %s2502_s2, 4096 }
  0x43   : > { %p1861_p8 = scmp.ne.s32.totalorder %s2502_s2, %s1860_s22  ;;  %p1867_p13 = scmp.lt.u32.totalorder %s1860_s22, %s2502_s2 }
  0x45   : > { %p1863_p9 = pnand %p1861_p8, %p2187_p3 }
  0x47   : > { %p1864_p12 = pneg %p1863_p9 }
  0x49   : > { %p1869_p2 = pnand %p1867_p13, %p1864_p12 }
  0x4b   : > { %1872 = shalt.err (!%p1869_p2)
}
  0x4c   : > { %s1873_s16 = scalar_lea.vmem %s2177_s19, 4096  ;;  %p1881_p7 = scmp.lt.s32.totalorder %s2177_s19, %s2177_s19 }
  0x4d   : > { %p1874_p4 = scmp.ne.s32.totalorder %s2177_s19, %s1873_s16  ;;  %p1882_p10 = scmp.lt.s32.totalorder %s1873_s16, %s1873_s16 }
  0x4f   : > { %p1876_p5 = pnand %p1874_p4, %p2187_p3  ;;  %p1883_p11 = por %p1882_p10, %p1881_p7 }
  0x51   : > { %p1877_p6 = pneg %p1876_p5 }
  0x53   : > { %p1884_p0 = pnand %p1883_p11, %p1877_p6 }
  0x55   : > { %1887 = shalt.err (!%p1884_p0)
}
  0x56   : > { %s2061_s7 = smov 64   ;;  %s2062_s15 = smov 4  }
  0x57   : > { %1604 = dma.hbm_to_vmem [thread:$0]  (!%p2173_p1), %s2502_s2, 4096, %s2177_s19, [#allocation7], %s2061_s7, %s2061_s7, %s2062_s15  }
  0x58   : > { %s2063_s21 = smov [#allocation11]   ;;  %s2503_s4 = sld [smem:[#allocation22_spill]] }
  0x59   : > { %s156_s22 = sshll.u32 %s2063_s21, 4  ;;  %s157_s22 = int_to_ptr.vmem [resolvable:$true] %s156_s22 }
  0x5e   : > { %s1888_s26 = scalar_lea.hbm %s2503_s4, 4096 }
  0x5f   : > { %p1889_p8 = scmp.ne.s32.totalorder %s2503_s4, %s1888_s26  ;;  %p1895_p13 = scmp.lt.u32.totalorder %s1888_s26, %s2503_s4 }
  0x61   : > { %p1891_p9 = pnand %p1889_p8, %p2187_p3 }
  0x63   : > { %p1892_p12 = pneg %p1891_p9 }
  0x65   : > { %p1897_p2 = pnand %p1895_p13, %p1892_p12 }
  0x67   : > { %1900 = shalt.err (!%p1897_p2)
}
  0x68   : > { %s1901_s19 = scalar_lea.vmem %s157_s22, 4096  ;;  %p1909_p7 = scmp.lt.s32.totalorder %s157_s22, %s157_s22 }
  0x69   : > { %p1902_p4 = scmp.ne.s32.totalorder %s157_s22, %s1901_s19  ;;  %p1910_p10 = scmp.lt.s32.totalorder %s1901_s19, %s1901_s19 }
  0x6b   : > { %p1904_p5 = pnand %p1902_p4, %p2187_p3  ;;  %p1911_p11 = por %p1910_p10, %p1909_p7 }
  0x6d   : > { %p1905_p6 = pneg %p1904_p5 }
  0x6f   : > { %p1912_p0 = pnand %p1911_p11, %p1905_p6 }
  0x71   : > { %1915 = shalt.err (!%p1912_p0)
}
  0x72   : > { %s2504_s7 = smov 8   ;;  %s2505_s15 = smov 128  }
  0x73   : > { %1610 = dma.hbm_to_vmem [thread:$0]  (!%p2173_p1), %s2503_s4, 4096, %s157_s22, [#allocation10], %s2505_s15, %s2505_s15, %s2504_s7  }
  0x74   : > { %p2506_p8 = scmp.ne.s32.totalorder %s2498_s14, 0 }
  0x75   : > { %p2507_p3 = scmp.eq.s32.totalorder (!%p2506_p8), %s2137_s0, 0 }
  0x76   : > { %172 = sbr.rel (%p2506_p8) target bundleno = 1177 (0x499), region = 32 }
  0x7d   : > { %2019 = dma.done.wait (%p2507_p3), [#allocation7], 4096   ;;  %p2508_p9 = pmov %p2507_p3 }
  0x7e   : > { %p2509_p12 = pmov %p2507_p3 }
  0x7f   : > { %2021 = vsyncadd (%p2508_p9), [#allocation7], 4294963200 }
  0x80   : > { %2023 = dma.done.wait (%p2509_p12), [#allocation10], 6144   ;;  %p2510_p13 = pmov %p2507_p3 }
  0x81   : > { %s2492_s17 = sand.u32 1, %s2038_s29   ;;  %s2266_s20 = smov 0  }
  0x82   : > { %2025 = vsyncadd (%p2510_p13), [#allocation10], 4294961152  ;;  %s1361_s14 = sshll.u32 %s2492_s17, 4 }
  0x83   : > { %s2264_s18 = scalar_lea.vmem [#allocation12], %s1361_s14 }
  0x84 LB: >> { %s2511_s25 = sshll.u32 %s2137_s0, 4  ;;  %s213_s24 = scalar_lea.vmem [#allocation2], %s2050_s20  ;;  %s2050_s20 = sphi %s2266_s20, %s207_s20  }
  0x85   : >> { %s208_s21 = sadd.s32 %s2050_s20, %s2511_s25  ;;  %s215_s26 = sshll.u32 %s213_s24, 4  ;;  %s2277_s26 = int_to_ptr.vmem [resolvable:$true] %s215_s26 }
  0x86   : >> { %s1363_s22 = sshll.u32 %s208_s21, 1  ;;  %s1291_s19 = scalar_lea.vmem %s213_s24, 32 [#allocation2] }
  0x87   : >> { %s210_s23 = sld [smem:[#allocation5 + %s1363_s22]]  ;;  %s219_s27 = sadd.s32 1, %s1363_s22 }
  0x88   : >> { %s2275_s16 = sld [smem:[#allocation5 + %s219_s27]]  ;;  %s226_s7 = sshll.u32 %s1291_s19, 4  ;;  %s2284_s7 = int_to_ptr.vmem [resolvable:$true] %s226_s7 }
  0x89   : >> { %s1918_s24 = scalar_lea.hbm %s2482_s1, 1536 }
  0x8d   : >> { %s1364_s15 = sshll.u32 %s210_s23, 4 }
  0x8e   : >> { %s2282_s14 = scalar_lea.hbm %s2482_s1, %s1364_s15 }
  0x8f   : >> { %s1916_s21 = scalar_lea.hbm %s2282_s14, 32  ;;  %p1919_p2 = scmp.lt.u32.totalorder %s2282_s14, %s2482_s1 }
  0x90   : >> { %p1917_p1 = scmp.ne.s32.totalorder %s2282_s14, %s1916_s21  ;;  %p1920_p4 = scmp.lt.u32.totalorder %s1918_s24, %s1916_s21 }
  0x91   : >> { %p1922_p6 = scmp.lt.u32.totalorder %s1916_s21, %s2282_s14 }
  0x92   : >> { %p1921_p5 = por %p1920_p4, %p1919_p2 }
  0x94   : >> { %p1923_p7 = por %p1922_p6, %p1921_p5 }
  0x96   : >> { %p1924_p10 = pnand %p1923_p7, %p1917_p1 }
  0x98   : >> { %1927 = shalt.err (!%p1924_p10)  }
  0x99   : >> { %s1928_s23 = scalar_lea.vmem %s2277_s26, 32  ;;  %s2064_s15 = smov [#allocation2]  }
  0x9a   : >> { %p1929_p11 = scmp.ne.s32.totalorder %s2277_s26, %s1928_s23  ;;  %s1930_s9 = sshll.u32 %s2064_s15, 4  ;;  %s1931_s9 = int_to_ptr.vmem [resolvable:$false] %s1930_s9 }
  0x9b   : >> { %s1932_s10 = scalar_lea.vmem %s1931_s9, 1024  ;;  %p1933_p0 = scmp.lt.s32.totalorder %s2277_s26, %s1931_s9 }
  0x9c   : >> { %p1934_p8 = scmp.lt.s32.totalorder %s1932_s10, %s1928_s23 }
  0x9e   : >> { %p1935_p3 = por %p1934_p8, %p1933_p0 }
  0xa0   : >> { %p1936_p9 = pnand %p1935_p3, %p1929_p11 }
  0xa2   : >> { %1939 = shalt.err (!%p1936_p9)  }
  0xa3   : >> { %s2065_s25 = smov 16   ;;  %s2066_s21 = smov 256  }
  0xa4   : >> { %s2067_s22 = smov 1   ;;  %s1365_s27 = sshll.u32 %s2275_s16, 4 }
  0xa5   : >> { %218 = dma.hbm_to_vmem [thread:$0]  %s2282_s14, 32, %s2277_s26, [#allocation3], %s2065_s25, %s2066_s21, %s2067_s22 }
  0xa6   : >> { %s222_s2 = scalar_lea.hbm %s2482_s1, %s1365_s27 }
  0xa7   : >> { %s1940_s15 = scalar_lea.hbm %s222_s2, 32  ;;  %p1943_p13 = scmp.lt.u32.totalorder %s222_s2, %s2482_s1 }
  0xa8   : >> { %p1941_p12 = scmp.ne.s32.totalorder %s222_s2, %s1940_s15  ;;  %p1944_p1 = scmp.lt.u32.totalorder %s1918_s24, %s1940_s15 }
  0xa9   : >> { %p1946_p4 = scmp.lt.u32.totalorder %s1940_s15, %s222_s2 }
  0xaa   : >> { %p1945_p2 = por %p1944_p1, %p1943_p13 }
  0xac   : >> { %p1947_p5 = por %p1946_p4, %p1945_p2 }
  0xae   : >> { %p1948_p6 = pnand %p1947_p5, %p1941_p12 }
  0xb0   : >> { %1951 = shalt.err (!%p1948_p6)  }
  0xb1   : >> { %s1952_s26 = scalar_lea.vmem %s2284_s7, 32  ;;  %p1957_p10 = scmp.lt.s32.totalorder %s2284_s7, %s1931_s9 }
  0xb2   : >> { %p1953_p7 = scmp.ne.s32.totalorder %s2284_s7, %s1952_s26  ;;  %p1958_p11 = scmp.lt.s32.totalorder %s1932_s10, %s1952_s26 }
  0xb4   : >> { %p1959_p0 = por %p1958_p11, %p1957_p10 }
  0xb6   : >> { %p1960_p8 = pnand %p1959_p0, %p1953_p7 }
  0xb8   : >> { %1963 = shalt.err (!%p1960_p8)  }
  0xb9   : >> { %229 = dma.hbm_to_vmem [thread:$0]  %s222_s2, 32, %s2284_s7, [#allocation3], %s2065_s25, %s2066_s21, %s2067_s22 }
  0xba   : >> { %s207_s20 = sadd.s32 1, %s2050_s20  }
  0xbb   : >> { %p204_p3 = scmp.ge.s32.totalorder %s207_s20, 16  }
  0xbc   : > { %s2052_s3 = smov (%p204_p3), 0  }
  0xbd   : > { %206 = sbr.rel (!%p204_p3) target bundleno = 132 (0x84), region = 98 }
  0xc4 LB: >> { %2026 = dma.done.wait [#allocation3], 64  ;;  %s2054_s3 = sphi %s2052_s3, %s235_s3  }
  0xc5   : >> { %2027 = vsyncadd [#allocation3], 4294967232  ;;  %s235_s3 = sadd.s32 1, %s2054_s3  }
  0xc6   : >> { %p232_p9 = scmp.ge.s32.totalorder %s235_s3, 16  }
  0xc7   : > { %v2315_v0 = vld [vmem:[#allocation2 + $0x10] sm:$0xff] (%p232_p9)  ;;  %v2317_v1 = vld [vmem:[#allocation2 + $0x18] sm:$0xff] (%p232_p9)  ;;  %v2319_v2 = vld [vmem:[#allocation2] sm:$0xff] (%p232_p9)  ;;  %v2068_v6 = vmov (%p232_p9), 0.0   ;;  %vm2069_vm0 = vmmov (%p232_p9), 0   ;;  %s1458_s2 = sshll.u32 (%p232_p9), %s2137_s0, 8 }
  0xc8   : > { %234 = sbr.rel (!%p232_p9) target bundleno = 196 (0xc4), region = 109  ;;  %v279_v3 = vmul.f32 (%p232_p9), %v2315_v0, %v2315_v0  ;;  %v244_v4 = vmul.f32 (%p232_p9), %v2319_v2, %v2319_v2  ;;  %v2325_v5 = vld [vmem:[#allocation2 + $0x8] sm:$0xff] (%p232_p9)  ;;  %1495 = vmatprep.subr.bf16.mxu0 (%p232_p9), %v2068_v6  ;;  %v2328_v7 = vld [vmem:[#allocation2 + $0x20] sm:$0xff] (%p232_p9)  ;;  %v280_v8 = vmul.f32 (%p232_p9), %v2317_v1, %v2317_v1  ;;  %v2336_v13 = vld [vmem:[#allocation2 + $0x30] sm:$0xff] (%p232_p9)  ;;  %1511 = vmatprep.mubr.msk.bf16.mxu0 (%p232_p9), %vm2069_vm0, %v2068_v6  ;;  %s1248_s4 = sshll.u32 (%p232_p9), %s2264_s18, 4  ;;  %s2434_s4 = int_to_ptr.vmem [resolvable:$true] %s1248_s4 }
  0xc9   : > { %v245_v9 = vmul.f32 (%p232_p9), %v2325_v5, %v2325_v5  ;;  %v1686_v10 = vld [vmem:[#allocation6 + $0x40] sm:$0xff] (%p232_p9)   ;;  %v2334_v11 = vld [vmem:[#allocation2 + $0x28] sm:$0xff] (%p232_p9)  ;;  %v2338_v14 = vld [vmem:[#allocation2 + $0x38] sm:$0xff] (%p232_p9)  ;;  %v491_v15 = vmul.f32 (%p232_p9), %v2328_v7, %v2328_v7  ;;  %v616_v18 = vmul.f32 (%p232_p9), %v2336_v13, %v2336_v13  ;;  %s2432_s16 = scalar_lea.hbm (%p232_p9), %s2486_s5, %s1458_s2  ;;  %s2512_s7 = sand.u32 (%p232_p9), 1, %s2038_s29  }
  0xca   : > { %281 = vadd.xlane.f32.xlu0 (%p232_p9), %v279_v3  ;;  %246 = vadd.xlane.f32.xlu1 (%p232_p9), %v244_v4  ;;  %v1687_v12 = vld [vmem:[#allocation6 + $0x48] sm:$0xff] (%p232_p9)   ;;  %v492_v16 = vmul.f32 (%p232_p9), %v2334_v11, %v2334_v11  ;;  %v1688_v17 = vld [vmem:[#allocation6 + $0x50] sm:$0xff] (%p232_p9)   ;;  %v617_v19 = vmul.f32 (%p232_p9), %v2338_v14, %v2338_v14  ;;  %v1689_v20 = vld [vmem:[#allocation6 + $0x58] sm:$0xff] (%p232_p9)   ;;  %s2440_s0 = scalar_lea.sflag (%p232_p9), [#allocation8], %s2512_s7  ;;  %s1964_s14 = scalar_lea.vmem (%p232_p9), %s2434_s4, 256 }
  0xcb   : > { %1496 = vmatpush3.bf16.msra.mxu0 (%p232_p9), %v1686_v10  ;;  %v1690_v21 = vld [vmem:[#allocation6 + $0x60] sm:$0xff] (%p232_p9)   ;;  %v1691_v22 = vld [vmem:[#allocation6 + $0x68] sm:$0xff] (%p232_p9)   ;;  %v1692_v23 = vld [vmem:[#allocation6 + $0x70] sm:$0xff] (%p232_p9)   ;;  %p1965_p12 = scmp.ne.s32.totalorder (%p232_p9), %s2434_s4, %s1964_s14  ;;  %p2513_p13 = scmp.ne.s32.totalorder (%p232_p9), %s2496_s12, 0 }
  0xcc   : > { %1497 = vmatprep.subr.bf16.mxu0 (%p232_p9), %v2068_v6  ;;  %v1693_v24 = vld [vmem:[#allocation6 + $0x78] sm:$0xff] (%p232_p9)   ;;  %v1718_v25 = vld [vmem:[#allocation9 + $0x4] ss:$8 sps:$4 sm:$0xff] (%p232_p9)   ;;  %v1720_v26 = vld [vmem:[#allocation9] ss:$8 sps:$4 sm:$0xff] (%p232_p9)   ;;  %s2071_s24 = smov (%p232_p9), [#allocation12]  }
  0xcd   : > { %v1721_v27 = vld [vmem:[#allocation9 + $0x14] ss:$8 sps:$4 sm:$0xff] (%p232_p9)   ;;  %835 = vmatprep.subr.bf16.mxu1 (%p232_p9), %v1718_v25  ;;  %v1723_v28 = vld [vmem:[#allocation9 + $0x10] ss:$8 sps:$4 sm:$0xff] (%p232_p9)   ;;  %v1724_v29 = vld [vmem:[#allocation9 + $0x24] ss:$8 sps:$4 sm:$0xff] (%p232_p9)   ;;  %p1966_p1 = pnand (%p232_p9), %p1965_p12, %p2513_p13 }
  0xce   : > { %283 = vadd.xlane.f32.xlu0 (%p232_p9), %v280_v8  ;;  %248 = vadd.xlane.f32.xlu1 (%p232_p9), %v245_v9  ;;  %v1726_v30 = vld [vmem:[#allocation9 + $0x20] ss:$8 sps:$4 sm:$0xff] (%p232_p9)   ;;  %v1727_v32 = vld [vmem:[#allocation9 + $0x34] ss:$8 sps:$4 sm:$0xff] (%p232_p9)   ;;  %v1729_v35 = vld [vmem:[#allocation9 + $0x30] ss:$8 sps:$4 sm:$0xff] (%p232_p9)  }
  0xcf   : > { %1498 = vmatpush3.bf16.msra.mxu0 %v1687_v12  ;;  %836 = vmatpush1.bf16.msra.mxu1 %v1720_v26  ;;  %v1730_v37 = vld [vmem:[#allocation9 + $0x44] ss:$8 sps:$4 sm:$0xff]   ;;  %v1732_v40 = vld [vmem:[#allocation9 + $0x40] ss:$8 sps:$4 sm:$0xff]   ;;  %v1733_v41 = vld [vmem:[#allocation9 + $0x54] ss:$8 sps:$4 sm:$0xff]   ;;  %p1967_p2 = pneg %p1966_p1 }
  0xd0   : > { %1499 = vmatprep.subr.bf16.mxu0 %v2068_v6  ;;  %837 = vmatprep.subr.bf16.mxu1 %v1721_v27  ;;  %v1735_v42 = vld [vmem:[#allocation9 + $0x50] ss:$8 sps:$4 sm:$0xff]   ;;  %v1736_v43 = vld [vmem:[#allocation9 + $0x64] ss:$8 sps:$4 sm:$0xff]   ;;  %v1738_v44 = vld [vmem:[#allocation9 + $0x60] ss:$8 sps:$4 sm:$0xff]  }
  0xd1   : > { %v1694_v50 = vld [vmem:[#allocation6] sm:$0xff]   ;;  %v1695_v52 = vld [vmem:[#allocation6 + $0x8] sm:$0xff]   ;;  %v1696_v55 = vld [vmem:[#allocation6 + $0x10] sm:$0xff]   ;;  %s1968_s23 = sshll.u32 %s2071_s24, 4  ;;  %s1969_s23 = int_to_ptr.vmem [resolvable:$false] %s1968_s23 }
  0xd2   : > { %493 = vadd.xlane.f32.xlu0 %v491_v15  ;;  %495 = vadd.xlane.f32.xlu1 %v492_v16  ;;  %v1697_v59 = vld [vmem:[#allocation6 + $0x18] sm:$0xff]   ;;  %v1698_v60 = vld [vmem:[#allocation6 + $0x20] sm:$0xff]   ;;  %v1699_v61 = vld [vmem:[#allocation6 + $0x28] sm:$0xff]   ;;  %s1970_s9 = scalar_lea.vmem %s1969_s23, 512  ;;  %p1971_p4 = scmp.lt.s32.totalorder %s2434_s4, %s1969_s23 }
  0xd3   : > { %1500 = vmatpush3.bf16.msra.mxu0 %v1688_v17  ;;  %838 = vmatpush1.bf16.msra.mxu1 %v1723_v28  ;;  %v1700_v62 = vld [vmem:[#allocation6 + $0x30] sm:$0xff]   ;;  %v1702_v8 = vld [vmem:[#allocation6 + $0x80] sm:$0xff]   ;;  %v1703_v15 = vld [vmem:[#allocation6 + $0x88] sm:$0xff]   ;;  %p1972_p5 = scmp.lt.s32.totalorder %s1970_s9, %s1964_s14 }
  0xd4   : > { %1501 = vmatprep.subr.bf16.mxu0 %v2068_v6  ;;  %839 = vmatprep.subr.bf16.mxu1 %v1724_v29  ;;  %v1709_v27 = vld [vmem:[#allocation6 + $0xb8] sm:$0xff]   ;;  %v1710_v29 = vld [vmem:[#allocation6 + $0xc0] sm:$0xff]  }
  0xd5   : > { %p1973_p6 = por %p1972_p5, %p1971_p4 }
  0xd6   : > { %618 = vadd.xlane.f32.xlu0 %v616_v18  ;;  %620 = vadd.xlane.f32.xlu1 %v617_v19  ;;  %v1705_v19 = vld [vmem:[#allocation6 + $0x98] sm:$0xff]  }
  0xd7   : > { %1502 = vmatpush3.bf16.msra.mxu0 %v1689_v20  ;;  %840 = vmatpush1.bf16.msra.mxu1 %v1726_v30  ;;  %v1706_v20 = vld [vmem:[#allocation6 + $0xa0] sm:$0xff]   ;;  %p1974_p7 = pnand %p1973_p6, %p1967_p2 }
  0xd8   : > { %1503 = vmatprep.subr.bf16.mxu0 %v2068_v6  ;;  %841 = vmatprep.subr.bf16.mxu1 %v1727_v32  ;;  %v1711_v32 = vld [vmem:[#allocation6 + $0xc8] sm:$0xff]  }
  0xdb   : > { %1504 = vmatpush3.bf16.msra.mxu0 %v1690_v21  ;;  %842 = vmatpush1.bf16.msra.mxu1 %v1729_v35  ;;  %v1707_v21 = vld [vmem:[#allocation6 + $0xa8] sm:$0xff]  }
  0xdc   : > { %1505 = vmatprep.subr.bf16.mxu0 %v2068_v6  ;;  %843 = vmatprep.subr.bf16.mxu1 %v1730_v37  ;;  %v1714_v37 = vld [vmem:[#allocation6 + $0xe0] sm:$0xff]  }
  0xdf   : > { %1506 = vmatpush3.bf16.msra.mxu0 %v1691_v22  ;;  %844 = vmatpush1.bf16.msra.mxu1 %v1732_v40 }
  0xe0   : > { %1507 = vmatprep.subr.bf16.mxu0 %v2068_v6  ;;  %845 = vmatprep.subr.bf16.mxu1 %v1733_v41  ;;  %v1716_v41 = vld [vmem:[#allocation6 + $0xf0] sm:$0xff]  }
  0xe3   : > { %1508 = vmatpush3.bf16.msra.mxu0 %v1692_v23  ;;  %846 = vmatpush1.bf16.msra.mxu1 %v1735_v42 }
  0xe4   : > { %1509 = vmatprep.subr.bf16.mxu0 %v2068_v6  ;;  %847 = vmatprep.subr.bf16.mxu1 %v1736_v43 }
  0xe7   : > { %1510 = vmatpush3.bf16.msra.mxu0 %v1693_v24  ;;  %848 = vmatpush1.bf16.msra.mxu1 %v1738_v44  ;;  %v1708_v24 = vld [vmem:[#allocation6 + $0xb0] sm:$0xff]   ;;  %v1717_v44 = vld [vmem:[#allocation6 + $0xf8] sm:$0xff]  }
  0xe8   : > { %1515 = vmatprep.subr.bf16.mxu0 %v2068_v6 }
 0x157   : > { %v282_v31 = vpop.xlane.xlu0 %281  ;;  %v247_v49 = vpop.xlane.xlu1 %246 }
 0x158   : > { %v285_v33 = vmul.f32 0.0078125, %v282_v31  ;;  %v251_v54 = vmul.f32 0.0078125, %v247_v49  ;;  %v1744_v49 = vld [vmem:[#allocation11 + $0x4] ss:$8 sps:$4 sm:$0xff]  }
 0x15a   : > { %v287_v34 = vadd.f32 1e-05, %v285_v33  ;;  %v253_v57 = vadd.f32 1e-05, %v251_v54  ;;  %v1712_v33 = vld [vmem:[#allocation6 + $0xd0] sm:$0xff]  }
 0x15b   : > { %v284_v36 = vpop.xlane.xlu0 %283  ;;  %v249_v53 = vpop.xlane.xlu1 %248  ;;  %v1747_v54 = vld [vmem:[#allocation11 + $0x14] ss:$8 sps:$4 sm:$0xff]  }
 0x15c   : > { %v286_v38 = vmul.f32 0.0078125, %v284_v36  ;;  %1790 = vrsqrt.f32 %v287_v34  ;;  %v252_v56 = vmul.f32 0.0078125, %v249_v53  ;;  %v1713_v36 = vld [vmem:[#allocation6 + $0xd8] sm:$0xff]  }
 0x15e   : > { %v288_v39 = vadd.f32 1e-05, %v286_v38  ;;  %v254_v58 = vadd.f32 1e-05, %v252_v56  ;;  %v1715_v38 = vld [vmem:[#allocation6 + $0xe8] sm:$0xff]  }
 0x15f   : > { %v494_v10 = vpop.xlane.xlu0 %493  ;;  %v496_v12 = vpop.xlane.xlu1 %495  ;;  %v1748_v56 = vld [vmem:[#allocation11 + $0x20] ss:$8 sps:$4 sm:$0xff]  }
 0x160   : > { %1792 = vrsqrt.f32 %v288_v39  ;;  %v497_v16 = vmul.f32 0.0078125, %v494_v10  ;;  %v498_v17 = vmul.f32 0.0078125, %v496_v12  ;;  %v1769_v10 = vld [vmem:[#allocation11 + $0x90] ss:$8 sps:$4 sm:$0xff]   ;;  %v1774_v12 = vld [vmem:[#allocation11 + $0xa4] ss:$8 sps:$4 sm:$0xff]  }
 0x161   : > { %1794 = vrsqrt.f32 %v253_v57  ;;  %v1753_v57 = vld [vmem:[#allocation11 + $0x34] ss:$8 sps:$4 sm:$0xff]  }
 0x162   : > { %1796 = vrsqrt.f32 %v254_v58  ;;  %v500_v18 = vadd.f32 1e-05, %v498_v17  ;;  %v1751_v58 = vld [vmem:[#allocation11 + $0x30] ss:$8 sps:$4 sm:$0xff]  }
 0x163   : > { %v619_v30 = vpop.xlane.xlu0 %618  ;;  %v621_v31 = vpop.xlane.xlu1 %620  ;;  %v1775_v17 = vld [vmem:[#allocation11 + $0xb0] ss:$8 sps:$4 sm:$0xff]  }
 0x166   : > { %v1791_v45 = vpop.eup %1790 }
 0x167   : > { %v291_v47 = vmul.f32 %v1791_v45, %v2315_v0 }
 0x16a   : > { %v1793_v46 = vpop.eup %1792 }
 0x16b   : > { %v292_v48 = vmul.f32 %v1793_v46, %v2317_v1  ;;  %v1795_v63 = vpop.eup %1794  ;;  %v1701_v1 = vld [vmem:[#allocation6 + $0x38] sm:$0xff]  }
 0x16c   : > { %v1797_v0 = vpop.eup %1796  ;;  %v257_v3 = vmul.f32 %v1795_v63, %v2319_v2  ;;  %v1704_v2 = vld [vmem:[#allocation6 + $0x90] sm:$0xff]   ;;  %v1762_v63 = vld [vmem:[#allocation11 + $0x64] ss:$8 sps:$4 sm:$0xff]  }
 0x16d   : > { %v293_v51 = vpack.c.bf16 %v292_v48, %v291_v47  ;;  %v258_v4 = vmul.f32 %v1797_v0, %v2325_v5  ;;  %v499_v5 = vadd.f32 1e-05, %v497_v16  ;;  %v1739_v46 = vld [vmem:[#allocation9 + $0x74] ss:$8 sps:$4 sm:$0xff]   ;;  %v1741_v47 = vld [vmem:[#allocation9 + $0x70] ss:$8 sps:$4 sm:$0xff]  }
 0x16e   : > { %849 = vmatprep.subr.bf16.mxu1 %v1739_v46  ;;  %v2070_v48 = vmov 0   ;;  %v1760_v0 = vld [vmem:[#allocation11 + $0x60] ss:$8 sps:$4 sm:$0xff]   ;;  %v1777_v16 = vld [vmem:[#allocation11 + $0xb4] ss:$8 sps:$4 sm:$0xff]  }
 0x16f   : > { %1512 = vmatmul.mubr.bf16.vlgmr.msra.gmra.mrb[0].mxu0 %v293_v51  ;;  %v259_v9 = vpack.c.bf16 %v258_v4, %v257_v3  ;;  %1798 = vrsqrt.f32 %v499_v5  ;;  %850 = vmatpush1.bf16.msra.mxu1 %v1741_v47  ;;  %v1763_v3 = vld [vmem:[#allocation11 + $0x70] ss:$8 sps:$4 sm:$0xff]   ;;  %v1768_v4 = vld [vmem:[#allocation11 + $0x84] ss:$8 sps:$4 sm:$0xff]   ;;  %v1778_v5 = vld [vmem:[#allocation11 + $0xc0] ss:$8 sps:$4 sm:$0xff]  }
 0x170   : > { %1516 = vmatpush3.bf16.msra.mxu0 %v1694_v50  ;;  %1531 = vmatprep.mubr.msk.bf16.mxu0 %vm2069_vm0, %v2068_v6  ;;  %1800 = vrsqrt.f32 %v500_v18  ;;  %v1783_v18 = vld [vmem:[#allocation11 + $0xd4] ss:$8 sps:$4 sm:$0xff]  }
 0x171   : > { %1517 = vmatprep.subr.bf16.mxu0 %v2068_v6  ;;  %867 = vmatprep.mubr.bf16.mxu1 %v2070_v48 }
 0x172   : > { %1176 = vmatprep.subr.bf16.mxu1 %v1744_v49 }
 0x174   : > { %1518 = vmatpush3.bf16.msra.mxu0 %v1695_v52  ;;  %v1742_v52 = vld [vmem:[#allocation11] ss:$8 sps:$4 sm:$0xff]  }
 0x175   : > { %1519 = vmatprep.subr.bf16.mxu0 %v2068_v6 }
 0x178   : > { %1520 = vmatpush3.bf16.msra.mxu0 %v1696_v55  ;;  %v1750_v55 = vld [vmem:[#allocation11 + $0x24] ss:$8 sps:$4 sm:$0xff]  }
 0x179   : > { %1521 = vmatprep.subr.bf16.mxu0 %v2068_v6  ;;  %v1799_v22 = vpop.eup %1798 }
 0x17a   : > { %v1801_v23 = vpop.eup %1800  ;;  %v503_v25 = vmul.f32 %v1799_v22, %v2328_v7  ;;  %v622_v7 = vmul.f32 0.0078125, %v619_v30  ;;  %v1789_v22 = vld [vmem:[#allocation11 + $0xf4] ss:$8 sps:$4 sm:$0xff]  }
 0x17b   : > { %v504_v26 = vmul.f32 %v1801_v23, %v2334_v11  ;;  %v623_v11 = vmul.f32 0.0078125, %v621_v31  ;;  %v1787_v23 = vld [vmem:[#allocation11 + $0xf0] ss:$8 sps:$4 sm:$0xff]  }
 0x17c   : > { %1522 = vmatpush3.bf16.msra.mxu0 %v1697_v59  ;;  %v624_v34 = vadd.f32 1e-05, %v622_v7  ;;  %v1756_v59 = vld [vmem:[#allocation11 + $0x44] ss:$8 sps:$4 sm:$0xff]  }
 0x17d   : > { %1523 = vmatprep.subr.bf16.mxu0 %v2068_v6  ;;  %v505_v28 = vpack.c.bf16 %v504_v26, %v503_v25  ;;  %v625_v35 = vadd.f32 1e-05, %v623_v11 }
 0x17e   : > { %1802 = vrsqrt.f32 %v624_v34 }
 0x17f   : > { %1804 = vrsqrt.f32 %v625_v35 }
 0x180   : > { %1524 = vmatpush3.bf16.msra.mxu0 %v1698_v60  ;;  %v1754_v60 = vld [vmem:[#allocation11 + $0x40] ss:$8 sps:$4 sm:$0xff]  }
 0x181   : > { %1525 = vmatprep.subr.bf16.mxu0 %v2068_v6 }
 0x184   : > { %1526 = vmatpush3.bf16.msra.mxu0 %v1699_v61  ;;  %v1759_v61 = vld [vmem:[#allocation11 + $0x54] ss:$8 sps:$4 sm:$0xff]  }
 0x185   : > { %1527 = vmatprep.subr.bf16.mxu0 %v2068_v6 }
 0x188   : > { %1528 = vmatpush3.bf16.msra.mxu0 %v1700_v62  ;;  %v1803_v39 = vpop.eup %1802  ;;  %v1757_v62 = vld [vmem:[#allocation11 + $0x50] ss:$8 sps:$4 sm:$0xff]  }
 0x189   : > { %1529 = vmatprep.subr.bf16.mxu0 %v2068_v6  ;;  %v1805_v40 = vpop.eup %1804  ;;  %v628_v42 = vmul.f32 %v1803_v39, %v2336_v13 }
 0x18a   : > { %v629_v43 = vmul.f32 %v1805_v40, %v2338_v14 }
 0x18c   : > { %1530 = vmatpush3.bf16.msra.mxu0 %v1701_v1  ;;  %v630_v45 = vpack.c.bf16 %v629_v43, %v628_v42  ;;  %v1765_v1 = vld [vmem:[#allocation11 + $0x74] ss:$8 sps:$4 sm:$0xff]  }
 0x18d   : > { %1535 = vmatprep.subr.bf16.mxu0 %v2068_v6 }
 0x18f   : > { %1532 = vmatmul.mubr.bf16.vlgmr.msra.gmra.mrb[0].mxu0 %v259_v9  ;;  %v1771_v9 = vld [vmem:[#allocation11 + $0x94] ss:$8 sps:$4 sm:$0xff]  }
 0x190   : > { %1536 = vmatpush3.bf16.msra.mxu0 %v1702_v8  ;;  %1551 = vmatprep.mubr.msk.bf16.mxu0 %vm2069_vm0, %v2068_v6  ;;  %v1766_v8 = vld [vmem:[#allocation11 + $0x80] ss:$8 sps:$4 sm:$0xff]  }
 0x191   : > { %1537 = vmatprep.subr.bf16.mxu0 %v2068_v6 }
 0x194   : > { %1538 = vmatpush3.bf16.msra.mxu0 %v1703_v15  ;;  %v1772_v15 = vld [vmem:[#allocation11 + $0xa0] ss:$8 sps:$4 sm:$0xff]  }
 0x195   : > { %1539 = vmatprep.subr.bf16.mxu0 %v2068_v6 }
 0x198   : > { %1540 = vmatpush3.bf16.msra.mxu0 %v1704_v2  ;;  %v1780_v2 = vld [vmem:[#allocation11 + $0xc4] ss:$8 sps:$4 sm:$0xff]  }
 0x199   : > { %1541 = vmatprep.subr.bf16.mxu0 %v2068_v6 }
 0x19c   : > { %1542 = vmatpush3.bf16.msra.mxu0 %v1705_v19  ;;  %v1781_v19 = vld [vmem:[#allocation11 + $0xd0] ss:$8 sps:$4 sm:$0xff]  }
 0x19d   : > { %1543 = vmatprep.subr.bf16.mxu0 %v2068_v6 }
 0x1a0   : > { %1544 = vmatpush3.bf16.msra.mxu0 %v1706_v20  ;;  %v1786_v20 = vld [vmem:[#allocation11 + $0xe4] ss:$8 sps:$4 sm:$0xff]  }
 0x1a1   : > { %1545 = vmatprep.subr.bf16.mxu0 %v2068_v6 }
 0x1a4   : > { %1546 = vmatpush3.bf16.msra.mxu0 %v1707_v21  ;;  %v1784_v21 = vld [vmem:[#allocation11 + $0xe0] ss:$8 sps:$4 sm:$0xff]  }
 0x1a5   : > { %1547 = vmatprep.subr.bf16.mxu0 %v2068_v6 }
 0x1a8   : > { %1548 = vmatpush3.bf16.msra.mxu0 %v1708_v24 }
 0x1a9   : > { %1549 = vmatprep.subr.bf16.mxu0 %v2068_v6 }
 0x1ac   : > { %1550 = vmatpush3.bf16.msra.mxu0 %v1709_v27 }
 0x1ad   : > { %1555 = vmatprep.subr.bf16.mxu0 %v2068_v6 }
 0x1af   : > { %1552 = vmatmul.mubr.bf16.vlgmr.msra.gmra.mrb[0].mxu0 %v505_v28 }
 0x1b0   : > { %1556 = vmatpush3.bf16.msra.mxu0 %v1710_v29  ;;  %1571 = vmatprep.mubr.msk.bf16.mxu0 %vm2069_vm0, %v2068_v6 }
 0x1b1   : > { %1557 = vmatprep.subr.bf16.mxu0 %v2068_v6 }
 0x1b4   : > { %1558 = vmatpush3.bf16.msra.mxu0 %v1711_v32 }
 0x1b5   : > { %1559 = vmatprep.subr.bf16.mxu0 %v2068_v6 }
 0x1b8   : > { %1560 = vmatpush3.bf16.msra.mxu0 %v1712_v33 }
 0x1b9   : > { %1561 = vmatprep.subr.bf16.mxu0 %v2068_v6 }
 0x1bc   : > { %1562 = vmatpush3.bf16.msra.mxu0 %v1713_v36 }
 0x1bd   : > { %1563 = vmatprep.subr.bf16.mxu0 %v2068_v6 }
 0x1c0   : > { %1564 = vmatpush3.bf16.msra.mxu0 %v1714_v37 }
 0x1c1   : > { %1565 = vmatprep.subr.bf16.mxu0 %v2068_v6 }
 0x1c4   : > { %1566 = vmatpush3.bf16.msra.mxu0 %v1715_v38 }
 0x1c5   : > { %1567 = vmatprep.subr.bf16.mxu0 %v2068_v6 }
 0x1c8   : > { %1568 = vmatpush3.bf16.msra.mxu0 %v1716_v41 }
 0x1c9   : > { %1569 = vmatprep.subr.bf16.mxu0 %v2068_v6  ;;  %v1745_v6 = vld [vmem:[#allocation11 + $0x10] ss:$8 sps:$4 sm:$0xff]  }
 0x1cc   : > { %1570 = vmatpush3.bf16.msra.mxu0 %v1717_v44 }
 0x1cf   : > { %1572 = vmatmul.mubr.bf16.vlgmr.msra.gmra.mrb[0].mxu0 %v630_v45 }
 0x2a2   : > { %v729_v50 = vpop.f32.mrb[0].mxu0 }
 0x2a3   : > { %v1573_v51 = vpop.f32.mrb[1].mxu0 }
 0x2a4   : > { %v732_v13 = vpop.f32.mrb[2].mxu0 }
 0x2a5   : > { %v738_v14 = vpack.c.bf16 %v732_v13, %v729_v50  ;;  %v1574_v53 = vpop.f32.mrb[3].mxu0 }
 0x2a7   : > { %868 = vmatmul.mubr.bf16.vlgmr.msra.gmra.mrb[0].mxu1 %v738_v14 }
 0x2a8   : > { %1177 = vmatpush1.bf16.msra.mxu1 %v1742_v52 }
 0x2a9   : > { %1178 = vmatprep.subr.bf16.mxu1 %v1747_v54 }
 0x2ac   : > { %1179 = vmatpush1.bf16.msra.mxu1 %v1745_v6 }
 0x2ad   : > { %1180 = vmatprep.subr.bf16.mxu1 %v1750_v55 }
 0x2b0   : > { %1181 = vmatpush1.bf16.msra.mxu1 %v1748_v56 }
 0x2b1   : > { %1182 = vmatprep.subr.bf16.mxu1 %v1753_v57 }
 0x2b4   : > { %1183 = vmatpush1.bf16.msra.mxu1 %v1751_v58 }
 0x2b5   : > { %1184 = vmatprep.subr.bf16.mxu1 %v1756_v59 }
 0x2b8   : > { %1185 = vmatpush1.bf16.msra.mxu1 %v1754_v60 }
 0x2b9   : > { %1186 = vmatprep.subr.bf16.mxu1 %v1759_v61 }
 0x2bc   : > { %1187 = vmatpush1.bf16.msra.mxu1 %v1757_v62 }
 0x2bd   : > { %1188 = vmatprep.subr.bf16.mxu1 %v1762_v63 }
 0x2c0   : > { %1189 = vmatpush1.bf16.msra.mxu1 %v1760_v0 }
 0x2c1   : > { %1190 = vmatprep.subr.bf16.mxu1 %v1765_v1 }
 0x2c4   : > { %1191 = vmatpush1.bf16.msra.mxu1 %v1763_v3 }
 0x2c5   : > { %1192 = vmatprep.subr.bf16.mxu1 %v1768_v4 }
 0x2c8   : > { %1193 = vmatpush1.bf16.msra.mxu1 %v1766_v8 }
 0x2c9   : > { %1194 = vmatprep.subr.bf16.mxu1 %v1771_v9 }
 0x2cc   : > { %1195 = vmatpush1.bf16.msra.mxu1 %v1769_v10 }
 0x2cd   : > { %1196 = vmatprep.subr.bf16.mxu1 %v1774_v12 }
 0x2d0   : > { %1197 = vmatpush1.bf16.msra.mxu1 %v1772_v15 }
 0x2d1   : > { %1198 = vmatprep.subr.bf16.mxu1 %v1777_v16 }
 0x2d4   : > { %1199 = vmatpush1.bf16.msra.mxu1 %v1775_v17 }
 0x2d5   : > { %1200 = vmatprep.subr.bf16.mxu1 %v1780_v2 }
 0x2d8   : > { %1201 = vmatpush1.bf16.msra.mxu1 %v1778_v5 }
 0x2d9   : > { %1202 = vmatprep.subr.bf16.mxu1 %v1783_v18 }
 0x2dc   : > { %1203 = vmatpush1.bf16.msra.mxu1 %v1781_v19 }
 0x2dd   : > { %1204 = vmatprep.subr.bf16.mxu1 %v1786_v20 }
 0x2e0   : > { %1205 = vmatpush1.bf16.msra.mxu1 %v1784_v21 }
 0x2e1   : > { %1206 = vmatprep.subr.bf16.mxu1 %v1789_v22 }
 0x2e4   : > { %1207 = vmatpush1.bf16.msra.mxu1 %v1787_v23 }
 0x37a   : > { %v2395_v24 = vpop.f32.mrb[0].mxu1 }
 0x37b   : > { %v2398_v25 = vmul.f32 0.70710677, %v2395_v24  ;;  %v2400_v26 = vpop.f32.mrb[1].mxu1 }
 0x37c   : > { %v2403_v27 = vmul.f32 0.70710677, %v2400_v26  ;;  %v2405_v28 = vpop.f32.mrb[2].mxu1 }
 0x37d   : > { %v886_v29 = vand.u32 2147483647, %v2398_v25  ;;  %v2409_v30 = vmul.f32 0.70710677, %v2405_v28  ;;  %v2412_v32 = vpop.f32.mrb[3].mxu1  ;;  %vm962_vm1 = vcmp.ge.f32.partialorder %v2398_v25, 0.0 }
 0x37e   : > { %v887_v31 = vand.u32 2147483647, %v2403_v27  ;;  %v2416_v34 = vmul.f32 0.70710677, %v2412_v32  ;;  %vm963_vm2 = vcmp.ge.f32.partialorder %v2403_v27, 0.0  ;;  %v879_v27 = vmul.f32 0.5, %v2400_v26 }
 0x37f   : > { %v890_v7 = vmul.f32 0.3275911, %v886_v29  ;;  %v888_v11 = vand.u32 2147483647, %v2409_v30  ;;  %v938_v42 = vsub.f32 0.0, %v886_v29  ;;  %vm964_vm3 = vcmp.ge.f32.partialorder %v2409_v30, 0.0 }
 0x380   : > { %v891_v33 = vmul.f32 0.3275911, %v887_v31  ;;  %v889_v38 = vand.u32 2147483647, %v2416_v34  ;;  %v939_v43 = vsub.f32 0.0, %v887_v31  ;;  %vm965_vm4 = vcmp.ge.f32.partialorder %v2416_v34, 0.0 }
 0x381   : > { %v894_v35 = vadd.f32 1.0, %v890_v7  ;;  %v892_v36 = vmul.f32 0.3275911, %v888_v11  ;;  %v942_v45 = vmul.f32 %v938_v42, %v886_v29  ;;  %v940_v46 = vsub.f32 0.0, %v888_v11 }
 0x382   : > { %v895_v37 = vadd.f32 1.0, %v891_v33  ;;  %v893_v40 = vmul.f32 0.3275911, %v889_v38  ;;  %v943_v49 = vmul.f32 %v939_v43, %v887_v31  ;;  %v941_v51 = vsub.f32 0.0, %v889_v38 }
 0x383   : > { %1806 = vrcp.f32 %v894_v35  ;;  %v896_v39 = vadd.f32 1.0, %v892_v36  ;;  %v946_v14 = vmul.f32 1.442695, %v942_v45  ;;  %v944_v54 = vmul.f32 %v940_v46, %v888_v11 }
 0x384   : > { %1808 = vrcp.f32 %v895_v37  ;;  %v897_v41 = vadd.f32 1.0, %v893_v40  ;;  %v948_v55 = vmul.f32 1.442695, %v943_v49  ;;  %v945_v59 = vmul.f32 %v941_v51, %v889_v38 }
 0x385   : > { %1810 = vrcp.f32 %v896_v39  ;;  %v950_v0 = vmul.f32 1.442695, %v944_v54 }
 0x386   : > { %1812 = vrcp.f32 %v897_v41  ;;  %v952_v9 = vmul.f32 1.442695, %v945_v59 }
 0x387   : > { %1814 = vpow2.f32 %v946_v14 }
 0x388   : > { %1816 = vpow2.f32 %v948_v55 }
 0x389   : > { %1818 = vpow2.f32 %v950_v0 }
 0x38a   : > { %1820 = vpow2.f32 %v952_v9 }
 0x38d   : > { %v1807_v44 = vpop.eup %1806 }
 0x38e   : > { %v1809_v47 = vpop.eup %1808  ;;  %v902_v48 = vmul.f32 1.0614054, %v1807_v44 }
 0x38f   : > { %v903_v50 = vmul.f32 1.0614054, %v1809_v47  ;;  %v1811_v52 = vpop.eup %1810 }
 0x390   : > { %v906_v13 = vadd.f32 -1.4531521, %v902_v48  ;;  %v904_v56 = vmul.f32 1.0614054, %v1811_v52  ;;  %v1813_v57 = vpop.eup %1812 }
 0x391   : > { %v907_v53 = vadd.f32 -1.4531521, %v903_v50  ;;  %v905_v62 = vmul.f32 1.0614054, %v1813_v57  ;;  %v1815_v7 = vpop.eup %1814 }
 0x392   : > { %v910_v6 = vmul.f32 %v1807_v44, %v906_v13  ;;  %v908_v61 = vadd.f32 -1.4531521, %v904_v56  ;;  %v1817_v33 = vpop.eup %1816 }
 0x393   : > { %v911_v58 = vmul.f32 %v1809_v47, %v907_v53  ;;  %v909_v4 = vadd.f32 -1.4531521, %v905_v62  ;;  %v1819_v42 = vpop.eup %1818 }
 0x394   : > { %v914_v60 = vadd.f32 1.4214138, %v910_v6  ;;  %v912_v3 = vmul.f32 %v1811_v52, %v908_v61  ;;  %v1821_v49 = vpop.eup %1820  ;;  %v881_v61 = vmul.f32 0.5, %v2412_v32 }
 0x395   : > { %v915_v63 = vadd.f32 1.4214138, %v911_v58  ;;  %v913_v15 = vmul.f32 %v1813_v57, %v909_v4 }
 0x396   : > { %v918_v1 = vmul.f32 %v1807_v44, %v914_v60  ;;  %v916_v12 = vadd.f32 1.4214138, %v912_v3 }
 0x397   : > { %v919_v8 = vmul.f32 %v1809_v47, %v915_v63  ;;  %v917_v5 = vadd.f32 1.4214138, %v913_v15 }
 0x398   : > { %v922_v10 = vadd.f32 -0.28449672, %v918_v1  ;;  %v920_v2 = vmul.f32 %v1811_v52, %v916_v12 }
 0x399   : > { %v923_v16 = vadd.f32 -0.28449672, %v919_v8  ;;  %v921_v21 = vmul.f32 %v1813_v57, %v917_v5 }
 0x39a   : > { %v926_v17 = vmul.f32 %v1807_v44, %v922_v10  ;;  %v924_v20 = vadd.f32 -0.28449672, %v920_v2 }
 0x39b   : > { %v927_v18 = vmul.f32 %v1809_v47, %v923_v16  ;;  %v925_v31 = vadd.f32 -0.28449672, %v921_v21 }
 0x39c   : > { %v930_v19 = vadd.f32 0.2548296, %v926_v17  ;;  %v928_v29 = vmul.f32 %v1811_v52, %v924_v20 }
 0x39d   : > { %v931_v22 = vadd.f32 0.2548296, %v927_v18  ;;  %v929_v37 = vmul.f32 %v1813_v57, %v925_v31 }
 0x39e   : > { %v934_v23 = vmul.f32 %v1807_v44, %v930_v19  ;;  %v932_v36 = vadd.f32 0.2548296, %v928_v29 }
 0x39f   : > { %v935_v11 = vmul.f32 %v1809_v47, %v931_v22  ;;  %v933_v41 = vadd.f32 0.2548296, %v929_v37 }
 0x3a0   : > { %v954_v35 = vmul.f32 %v1815_v7, %v934_v23  ;;  %v936_v40 = vmul.f32 %v1811_v52, %v932_v36  ;;  %v878_v52 = vmul.f32 0.5, %v2395_v24 }
 0x3a1   : > { %v955_v38 = vmul.f32 %v1817_v33, %v935_v11  ;;  %v937_v48 = vmul.f32 %v1813_v57, %v933_v41  ;;  %v880_v57 = vmul.f32 0.5, %v2405_v28 }
 0x3a2   : > { %v958_v39 = vsub.f32 1.0, %v954_v35  ;;  %v956_v46 = vmul.f32 %v1819_v42, %v936_v40 }
 0x3a3   : > { %v959_v43 = vsub.f32 1.0, %v955_v38  ;;  %v957_v47 = vmul.f32 %v1821_v49, %v937_v48 }
 0x3a4   : > { %v966_v45 = vsub.f32 0.0, %v958_v39  ;;  %v960_v51 = vsub.f32 1.0, %v956_v46 }
 0x3a5   : > { %v967_v44 = vsub.f32 0.0, %v959_v43  ;;  %v961_v53 = vsub.f32 1.0, %v957_v47 }
 0x3a6   : > { %v970_v50 = vsel %vm962_vm1, %v958_v39, %v966_v45  ;;  %v968_v14 = vsub.f32 0.0, %v960_v51 }
 0x3a7   : > { %v971_v13 = vsel %vm963_vm2, %v959_v43, %v967_v44  ;;  %v974_v54 = vadd.f32 1.0, %v970_v50  ;;  %v969_v55 = vsub.f32 0.0, %v961_v53 }
 0x3a8   : > { %v972_v6 = vsel %vm964_vm3, %v960_v51, %v968_v14  ;;  %v975_v56 = vadd.f32 1.0, %v971_v13 }
 0x3a9   : > { %v976_v25 = vadd.f32 1.0, %v972_v6  ;;  %v973_v58 = vsel %vm965_vm4, %v961_v53, %v969_v55  ;;  %v978_v59 = vmul.f32 %v974_v54, %v878_v52 }
 0x3aa   : > { %v977_v30 = vadd.f32 1.0, %v973_v58  ;;  %v979_v24 = vmul.f32 %v975_v56, %v879_v27 }
 0x3ab   : > { %v980_v60 = vmul.f32 %v976_v25, %v880_v57 }
 0x3ac   : > { %v981_v63 = vmul.f32 %v977_v30, %v881_v61 }
 0x3ad   : > { %v982_v62 = vpack.c.bf16 %v980_v60, %v978_v59 }
 0x3ae   : > { %v983_v28 = vpack.c.bf16 %v981_v63, %v979_v24 }
 0x3b0   : > { %1208 = vmatprep.mubr.bf16.mxu1 %v983_v28 }
 0x3b1   : > { %1209 = vmatmul.mubr.bf16.vlgmr.msra.gmra.mrb[4].mxu1 %v982_v62 }
 0x484   : > { %v1210_v0 = vpop.f32.mrb[4].mxu1 }
 0x485   : > { %v1212_v26 = vpop.f32.mrb[5].mxu1 }
 0x486   : > { %v1455_v34 = vpack.c.bf16 %v1212_v26, %v1210_v0  ;;  %v1214_v1 = vpop.f32.mrb[6].mxu1 }
 0x487   : > { %v1216_v3 = vpop.f32.mrb[7].mxu1 }
 0x488   : > { %1231 = vst [vmem:[%s2264_s18] sm:$0xff] %v1455_v34  ;;  %v1456_v32 = vpack.c.bf16 %v1216_v3, %v1214_v1 }
 0x48a   : > { %1232 = vst [vmem:[%s2264_s18 + $0x8] sm:$0xff] %v1456_v32 }
 0x48b   : > { %1977 = shalt.err (!%p1974_p7)
}
 0x48c   : > { %s1978_s18 = scalar_lea.hbm %s2432_s16, 256  ;;  %s1982_s21 = scalar_lea.hbm %s2486_s5, 512 }
 0x48d   : > { %p1979_p10 = scmp.ne.s32.totalorder %s2432_s16, %s1978_s18  ;;  %p1983_p8 = scmp.lt.u32.totalorder %s2432_s16, %s2486_s5 }
 0x48e   : > { %p1984_p3 = scmp.lt.u32.totalorder %s1982_s21, %s1978_s18  ;;  %p1986_p12 = scmp.lt.u32.totalorder %s1978_s18, %s2432_s16 }
 0x48f   : > { %p1980_p11 = pnand %p1979_p10, %p2513_p13 }
 0x490   : > { %p1985_p9 = por %p1984_p3, %p1983_p8 }
 0x491   : > { %p1981_p0 = pneg %p1980_p11 }
 0x492   : > { %p1987_p1 = por %p1986_p12, %p1985_p9 }
 0x494   : > { %p1988_p2 = pnand %p1987_p1, %p1981_p0 }
 0x496   : > { %1991 = shalt.err (!%p1988_p2)
}
 0x497   : > { %s2072_s19 = smov 128   ;;  %s2073_s15 = smov 8  }
 0x498   : > { %1599 = dma.vmem_to_hbm [thread:$0]  (%p2513_p13), %s2434_s4, 256, %s2432_s16, %s2440_s0, %s2072_s19, %s2072_s19, %s2073_s15  }
 0x499 PF: > { %p1621_p4 = scmp.ge.s32.totalorder %s2046_s6, 2  ;;  %s1263_s26 = sand.u32 1, %s2034_s28  }
 0x49a   : > { %p2514_p5 = scmp.ne.s32.totalorder %s2497_s13, 0  ;;  %s1264_s3 = scalar_lea.sflag [#allocation8], %s1263_s26 }
 0x49c   : > { %p1612_p6 = pnand %p1621_p4, %p2514_p5 }
 0x49e   : > { %2029 = dma.done.wait (!%p1612_p6), %s1264_s3, 256  }
 0x49f   : > { %2031 = vsyncadd (!%p1612_p6), %s1264_s3, 4294967040  ;;  %p21_p7 = scmp.ge.s32.totalorder %s2141_s8, 4   ;;  %s2515_s28 = smov %s2038_s29 }
 0x4a0   : > { %s2516_s29 = smov %s2042_s30  ;;  %s2517_s30 = smov %s2152_s11 }
 0x4a1   : > { %s2518_s6 = smov %s2141_s8  ;;  %23 = sbr.rel (!%p21_p7) target bundleno = 18 (0x12), region = 120 }
 0x4a8   :  { %1269 = vsyncpa [#allocation7], 1 }
 0x4a9   :  { %1271 = vsyncpa [#allocation7 + $0x1], 1 }
 0x4aa   :  { %1272 = vsyncpa [#allocation10], 1 }
 0x4ab   :  { %1273 = vsyncpa [#allocation8], 1 }
 0x4ac   :  { %1275 = vsyncpa [#allocation8 + $0x1], 1 }
 0x4ad   :  { %1276 = vsyncmov [#allocation3] }
 0x4b0   :  { %s1277_s6 = vpop.sfrf %1276 }
 0x4b1   :  { %p1454_p13 = scmp.ne.s32.totalorder %s1277_s6, 0 }
 0x4b3   :  { %1281 = shalt.err (%p1454_p13)  }

</bundles_post_ra>
